<compile_context>
chip_gen: v6e
topology: v6e:2x2x1
jax: 0.10.0
libtpu: 0.0.40
codegen_flags: <defaults>
</compile_context>

<pallas_src>
import functools

import jax
import jax.numpy as jnp
from jax.experimental import pallas as pl
from jax.experimental.pallas import tpu as pltpu


def _sigmoid(v):
    return 1.0 / (1.0 + jnp.exp(-v))


def _lstm_cell(gates, c_prev, H):
    i_g = _sigmoid(gates[:, 0:H])
    f_g = _sigmoid(gates[:, H:2 * H])
    g_g = jnp.tanh(gates[:, 2 * H:3 * H])
    o_g = _sigmoid(gates[:, 3 * H:4 * H])
    c_new = f_g * c_prev + i_g * g_g
    h_new = o_g * jnp.tanh(c_new)
    return h_new, c_new


def decoder_kernel(x_ref, h0_ref, c0_ref, wih0_ref, whh0_ref, b0_ref,
                   wf_ref, bf_ref, wfc_ref, bfc_ref, out_ref):
    # x_ref : (L*Bp, H) embedded decoder inputs, time-major & flattened
    # h0/c0 : (num_layers, Bp, H)
    # wih0/whh0 : (H, 4H), b0 : (1, 4H)                      -- layer 0
    # wf : (num_layers-1, 2H, 4H), bf : (num_layers-1, 1, 4H) -- layers >= 1, fused
    # wfc : (H, O), bfc : (1, O)
    # out : (L*Bp, O) log-probs, time-major & flattened
    num_layers, Bp, H = h0_ref.shape
    LB, O = out_ref.shape
    L = LB // Bp

    # recurrent state lives in registers for the whole kernel
    h = [h0_ref[l] for l in range(num_layers)]
    c = [c0_ref[l] for l in range(num_layers)]

    # hoisted layer-0 input projection: one big MXU op off the critical path
    xg0 = jnp.dot(x_ref[...], wih0_ref[...],
                  preferred_element_type=jnp.float32) + b0_ref[...]      # (L*Bp, 4H)

    h_last = []
    for t in range(L):  # static unrolled time loop (max_length small & static)
        # layer 0: only the recurrent matmul sits on the serial chain
        gates = xg0[t * Bp:(t + 1) * Bp] + jnp.dot(
            h[0], whh0_ref[...], preferred_element_type=jnp.float32)
        h[0], c[0] = _lstm_cell(gates, c[0], H)
        x = h[0]

        # layers >= 1: single fused [x, h_prev] @ [W_ih; W_hh] matmul per cell
        for l in range(1, num_layers):
            xin = jnp.concatenate([x, h[l]], axis=-1)                    # (Bp, 2H)
            gates = jnp.dot(xin, wf_ref[l - 1],
                            preferred_element_type=jnp.float32) + bf_ref[l - 1]
            h[l], c[l] = _lstm_cell(gates, c[l], H)
            x = h[l]

        h_last.append(x)

    # batched FC head + activations (off the recurrence), single writeback
    h_all = jnp.concatenate(h_last, axis=0)                              # (L*Bp, H)
    logits = jnp.dot(h_all, wfc_ref[...],
                     preferred_element_type=jnp.float32) + bfc_ref[...]  # (L*Bp, O)

    acts = logits[:, :O - 1]
    m = jnp.max(acts, axis=-1, keepdims=True)
    lse = jnp.log(jnp.sum(jnp.exp(acts - m), axis=-1, keepdims=True)) + m
    acts_lp = acts - lse

    d = logits[:, O - 1:O]
    # stable log(sigmoid(d)) = min(d, 0) - log(1 + exp(-|d|))
    dur_lp = jnp.minimum(d, 0.0) - jnp.log(1.0 + jnp.exp(-jnp.abs(d)))

    out_ref[...] = jnp.concatenate([acts_lp, dur_lp], axis=-1)


def decoder_forward(params, hidden, cell, target, sos=0):
    """Teacher-forcing forward pass. Returns (B, max_length, output_size) log-probs."""
    B, L, _ = target.shape
    num_layers, _, H = hidden.shape
    O = params["fc_w_t"].shape[1]

    # decoder input at step 0 is [sos, 0]; step i>0 uses target[:, i-1]
    sos_step = jnp.zeros((B, 1, 2), jnp.float32).at[:, :, 0].set(float(sos))
    inputs = jnp.concatenate([sos_step, target[:, :L - 1, :]], axis=1)   # (B, L, 2)

    # embedding (int32 lookup) + duration concat in plain JAX
    idx = inputs[..., 0].astype(jnp.int32)                               # (B, L)
    dur = inputs[..., 1:2]                                               # (B, L, 1)
    emb = jnp.take(params["emb"], idx, axis=0)                           # (B, L, H-1)
    x_seq = jnp.concatenate([emb, dur], axis=-1)                         # (B, L, H)
    x_tm = jnp.transpose(x_seq, (1, 0, 2))                               # (L, B, H)

    # pad batch to a multiple of 8 sublanes
    Bp = ((B + 7) // 8) * 8
    pad_b = Bp - B
    if pad_b:
        x_tm = jnp.pad(x_tm, ((0, 0), (0, pad_b), (0, 0)))
        hidden_p = jnp.pad(hidden, ((0, 0), (0, pad_b), (0, 0)))
        cell_p = jnp.pad(cell, ((0, 0), (0, pad_b), (0, 0)))
    else:
        hidden_p, cell_p = hidden, cell
    x_flat = x_tm.reshape(L * Bp, H)

    # fused [W_ih; W_hh] weights for layers >= 1
    if num_layers > 1:
        w_fused = jnp.concatenate([params["w_ih_t"][1:], params["w_hh_t"][1:]], axis=1)
        b_fused = params["b"][1:]
    else:  # dummy (unused) block so the kernel signature stays fixed
        w_fused = jnp.zeros((1, 2 * H, 4 * H), jnp.float32)
        b_fused = jnp.zeros((1, 1, 4 * H), jnp.float32)

    out_flat = pl.pallas_call(
        decoder_kernel,
        out_shape=jax.ShapeDtypeStruct((L * Bp, O), jnp.float32),
        in_specs=[pl.BlockSpec(memory_space=pltpu.MemorySpace.VMEM)] * 10,
        out_specs=pl.BlockSpec(memory_space=pltpu.MemorySpace.VMEM),
    )(x_flat, hidden_p, cell_p,
      params["w_ih_t"][0], params["w_hh_t"][0], params["b"][0],
      w_fused, b_fused, params["fc_w_t"], params["fc_b"])

    out_tm = out_flat.reshape(L, Bp, O)[:, :B, :]                        # (L, B, O)
    return jnp.transpose(out_tm, (1, 0, 2))                              # (B, L, O)


def init_params(key, input_size, hidden_size, output_size, num_layers):
    ks = jax.random.split(key, 6)
    s = 1.0 / float(hidden_size) ** 0.5
    emb = 0.5 * jax.random.normal(ks[0], (input_size, hidden_size - 1), jnp.float32)
    # LSTM weights pre-transposed: (num_layers, H, 4H); biases folded (b_ih + b_hh)
    w_ih_t = jax.random.uniform(ks[1], (num_layers, hidden_size, 4 * hidden_size),
                                jnp.float32, -s, s)
    w_hh_t = jax.random.uniform(ks[2], (num_layers, hidden_size, 4 * hidden_size),
                                jnp.float32, -s, s)
    b = jax.random.uniform(ks[3], (num_layers, 1, 4 * hidden_size), jnp.float32, -s, s)
    fc_w_t = jax.random.uniform(ks[4], (hidden_size, output_size), jnp.float32, -s, s)
    fc_b = jax.random.uniform(ks[5], (1, output_size), jnp.float32, -s, s)
    return dict(emb=emb, w_ih_t=w_ih_t, w_hh_t=w_hh_t, b=b, fc_w_t=fc_w_t, fc_b=fc_b)


def reference_forward(params, hidden, cell, target, sos=0):
    """Pure-JAX reference mirroring the PyTorch forward (teacher forcing)."""
    B, L, _ = target.shape
    num_layers, _, H = hidden.shape
    O = params["fc_w_t"].shape[1]
    dot = functools.partial(jnp.matmul, precision=jax.lax.Precision.HIGHEST)

    sos_step = jnp.zeros((B, 1, 2), jnp.float32).at[:, :, 0].set(float(sos))
    inputs = jnp.concatenate([sos_step, target[:, :L - 1, :]], axis=1)
    h, c = hidden, cell
    outs = []
    for t in range(L):
        idx = inputs[:, t, 0].astype(jnp.int32)
        dur = inputs[:, t, 1:2]
        x = jnp.concatenate([params["emb"][idx], dur], axis=-1)
        new_h, new_c = [], []
        for l in range(num_layers):
            gates = dot(x, params["w_ih_t"][l]) + dot(h[l], params["w_hh_t"][l]) + params["b"][l]
            i_g = jax.nn.sigmoid(gates[:, :H])
            f_g = jax.nn.sigmoid(gates[:, H:2 * H])
            g_g = jnp.tanh(gates[:, 2 * H:3 * H])
            o_g = jax.nn.sigmoid(gates[:, 3 * H:])
            cn = f_g * c[l] + i_g * g_g
            hn = o_g * jnp.tanh(cn)
            new_h.append(hn)
            new_c.append(cn)
            x = hn
        h, c = jnp.stack(new_h), jnp.stack(new_c)
        outs.append(dot(x, params["fc_w_t"]) + params["fc_b"])
    outputs = jnp.stack(outs, axis=1)                                    # (B, L, O)
    acts_lp = jax.nn.log_softmax(outputs[..., :O - 1], axis=-1)
    dur_lp = jax.nn.log_sigmoid(outputs[..., O - 1:])
    return jnp.concatenate([acts_lp, dur_lp], axis=-1)


if __name__ == "__main__":
    INPUT_SIZE = 6    # activity vocabulary size (embedding rows)
    HIDDEN = 32
    OUTPUT = 6        # 5 activity logits + 1 duration channel
    NUM_LAYERS = 2
    MAX_LEN = 8
    B = 4
    SOS = 0

    key = jax.random.PRNGKey(0)
    kp, kh, kc, ka, kd = jax.random.split(key, 5)
    params = init_params(kp, INPUT_SIZE, HIDDEN, OUTPUT, NUM_LAYERS)
    hidden = 0.1 * jax.random.normal(kh, (NUM_LAYERS, B, HIDDEN), jnp.float32)
    cell = 0.1 * jax.random.normal(kc, (NUM_LAYERS, B, HIDDEN), jnp.float32)
    acts_idx = jax.random.randint(ka, (B, MAX_LEN, 1), 0, INPUT_SIZE).astype(jnp.float32)
    durations = jax.random.uniform(kd, (B, MAX_LEN, 1), jnp.float32)
    target = jnp.concatenate([acts_idx, durations], axis=-1)             # (B, L, 2)

    out = decoder_forward(params, hidden, cell, target, sos=SOS)
    out = jax.block_until_ready(out)

    ref = reference_forward(params, hidden, cell, target, sos=SOS)
    assert out.shape == (B, MAX_LEN, OUTPUT)
    assert bool(jnp.all(jnp.isfinite(out)))
    max_err = float(jnp.max(jnp.abs(out - ref)))
    assert bool(jnp.allclose(out, ref, atol=2e-3, rtol=2e-3)), f"max_err={max_err}"
    print("KERNEL_OK")
</pallas_src>

<mosaic_0001>
module attributes {stable_mosaic.version = 11 : i64} {
  func.func @decoder_kernel(%arg0: memref<64x32xf32, #tpu.memory_space<vmem>>, %arg1: memref<2x8x32xf32, #tpu.memory_space<vmem>>, %arg2: memref<2x8x32xf32, #tpu.memory_space<vmem>>, %arg3: memref<32x128xf32, #tpu.memory_space<vmem>>, %arg4: memref<32x128xf32, #tpu.memory_space<vmem>>, %arg5: memref<1x128xf32, #tpu.memory_space<vmem>>, %arg6: memref<1x64x128xf32, #tpu.memory_space<vmem>>, %arg7: memref<1x1x128xf32, #tpu.memory_space<vmem>>, %arg8: memref<32x6xf32, #tpu.memory_space<vmem>>, %arg9: memref<1x6xf32, #tpu.memory_space<vmem>>, %arg10: memref<64x6xf32, #tpu.memory_space<vmem>>) attributes {dimension_semantics = [], scalar_prefetch = 0 : i64, scratch_operands = 0 : i64, tpu.core_type = #tpu.core_type<tc>} {
    %c0 = arith.constant 0 : index
    %c0_0 = arith.constant 0 : index
    %c0_1 = arith.constant 0 : index
    %0 = vector.load %arg1[%c0, %c0_0, %c0_1] : memref<2x8x32xf32, #tpu.memory_space<vmem>>, vector<1x8x32xf32>
    %1 = vector.shape_cast %0 : vector<1x8x32xf32> to vector<8x32xf32>
    %c1 = arith.constant 1 : index
    %c0_2 = arith.constant 0 : index
    %c0_3 = arith.constant 0 : index
    %2 = vector.load %arg1[%c1, %c0_2, %c0_3] : memref<2x8x32xf32, #tpu.memory_space<vmem>>, vector<1x8x32xf32>
    %3 = vector.shape_cast %2 : vector<1x8x32xf32> to vector<8x32xf32>
    %c0_4 = arith.constant 0 : index
    %c0_5 = arith.constant 0 : index
    %c0_6 = arith.constant 0 : index
    %4 = vector.load %arg2[%c0_4, %c0_5, %c0_6] : memref<2x8x32xf32, #tpu.memory_space<vmem>>, vector<1x8x32xf32>
    %5 = vector.shape_cast %4 : vector<1x8x32xf32> to vector<8x32xf32>
    %c1_7 = arith.constant 1 : index
    %c0_8 = arith.constant 0 : index
    %c0_9 = arith.constant 0 : index
    %6 = vector.load %arg2[%c1_7, %c0_8, %c0_9] : memref<2x8x32xf32, #tpu.memory_space<vmem>>, vector<1x8x32xf32>
    %7 = vector.shape_cast %6 : vector<1x8x32xf32> to vector<8x32xf32>
    %c0_10 = arith.constant 0 : index
    %c0_11 = arith.constant 0 : index
    %8 = vector.load %arg0[%c0_10, %c0_11] : memref<64x32xf32, #tpu.memory_space<vmem>>, vector<64x32xf32>
    %c0_12 = arith.constant 0 : index
    %c0_13 = arith.constant 0 : index
    %9 = vector.load %arg3[%c0_12, %c0_13] : memref<32x128xf32, #tpu.memory_space<vmem>>, vector<32x128xf32>
    %cst = arith.constant dense<0.000000e+00> : vector<64x128xf32>
    %10 = tpu.matmul %8, %9, %cst {dimension_numbers = #tpu.dot_dimension_numbers<[1], [0], [0], [1], [0, 0, 1, 1], [], []>} : vector<64x32xf32>, vector<32x128xf32>, vector<64x128xf32> -> vector<64x128xf32>
    %c0_14 = arith.constant 0 : index
    %c0_15 = arith.constant 0 : index
    %11 = vector.load %arg5[%c0_14, %c0_15] : memref<1x128xf32, #tpu.memory_space<vmem>>, vector<1x128xf32>
    %12 = vector.broadcast %11 : vector<1x128xf32> to vector<64x128xf32>
    %13 = arith.addf %10, %12 : vector<64x128xf32>
    %14 = vector.extract_strided_slice %13 {offsets = [0, 0], sizes = [8, 128], strides = [1, 1]} : vector<64x128xf32> to vector<8x128xf32>
    %c0_16 = arith.constant 0 : index
    %c0_17 = arith.constant 0 : index
    %15 = vector.load %arg4[%c0_16, %c0_17] : memref<32x128xf32, #tpu.memory_space<vmem>>, vector<32x128xf32>
    %cst_18 = arith.constant dense<0.000000e+00> : vector<8x128xf32>
    %16 = tpu.matmul %1, %15, %cst_18 {dimension_numbers = #tpu.dot_dimension_numbers<[1], [0], [0], [1], [0, 0, 1, 1], [], []>} : vector<8x32xf32>, vector<32x128xf32>, vector<8x128xf32> -> vector<8x128xf32>
    %17 = arith.addf %14, %16 : vector<8x128xf32>
    %18 = vector.extract_strided_slice %17 {offsets = [0, 0], sizes = [8, 32], strides = [1, 1]} : vector<8x128xf32> to vector<8x32xf32>
    %cst_19 = arith.constant 0.000000e+00 : f32
    %19 = vector.broadcast %cst_19 : f32 to vector<8x32xf32>
    %20 = arith.subf %19, %18 : vector<8x32xf32>
    %21 = math.exp %20 : vector<8x32xf32>
    %cst_20 = arith.constant 1.000000e+00 : f32
    %22 = vector.broadcast %cst_20 : f32 to vector<8x32xf32>
    %23 = arith.addf %22, %21 : vector<8x32xf32>
    %cst_21 = arith.constant 1.000000e+00 : f32
    %24 = vector.broadcast %cst_21 : f32 to vector<8x32xf32>
    %25 = arith.divf %24, %23 : vector<8x32xf32>
    %26 = vector.extract_strided_slice %17 {offsets = [0, 32], sizes = [8, 32], strides = [1, 1]} : vector<8x128xf32> to vector<8x32xf32>
    %cst_22 = arith.constant 0.000000e+00 : f32
    %27 = vector.broadcast %cst_22 : f32 to vector<8x32xf32>
    %28 = arith.subf %27, %26 : vector<8x32xf32>
    %29 = math.exp %28 : vector<8x32xf32>
    %cst_23 = arith.constant 1.000000e+00 : f32
    %30 = vector.broadcast %cst_23 : f32 to vector<8x32xf32>
    %31 = arith.addf %30, %29 : vector<8x32xf32>
    %cst_24 = arith.constant 1.000000e+00 : f32
    %32 = vector.broadcast %cst_24 : f32 to vector<8x32xf32>
    %33 = arith.divf %32, %31 : vector<8x32xf32>
    %34 = vector.extract_strided_slice %17 {offsets = [0, 64], sizes = [8, 32], strides = [1, 1]} : vector<8x128xf32> to vector<8x32xf32>
    %35 = math.tanh %34 : vector<8x32xf32>
    %36 = vector.extract_strided_slice %17 {offsets = [0, 96], sizes = [8, 32], strides = [1, 1]} : vector<8x128xf32> to vector<8x32xf32>
    %cst_25 = arith.constant 0.000000e+00 : f32
    %37 = vector.broadcast %cst_25 : f32 to vector<8x32xf32>
    %38 = arith.subf %37, %36 : vector<8x32xf32>
    %39 = math.exp %38 : vector<8x32xf32>
    %cst_26 = arith.constant 1.000000e+00 : f32
    %40 = vector.broadcast %cst_26 : f32 to vector<8x32xf32>
    %41 = arith.addf %40, %39 : vector<8x32xf32>
    %cst_27 = arith.constant 1.000000e+00 : f32
    %42 = vector.broadcast %cst_27 : f32 to vector<8x32xf32>
    %43 = arith.divf %42, %41 : vector<8x32xf32>
    %44 = arith.mulf %33, %5 : vector<8x32xf32>
    %45 = arith.mulf %25, %35 : vector<8x32xf32>
    %46 = arith.addf %44, %45 : vector<8x32xf32>
    %47 = math.tanh %46 : vector<8x32xf32>
    %48 = arith.mulf %43, %47 : vector<8x32xf32>
    %49 = tpu.concatenate %48, %3 in 1 : vector<8x32xf32>, vector<8x32xf32> -> vector<8x64xf32>
    %c0_28 = arith.constant 0 : index
    %c0_29 = arith.constant 0 : index
    %c0_30 = arith.constant 0 : index
    %50 = vector.load %arg6[%c0_28, %c0_29, %c0_30] : memref<1x64x128xf32, #tpu.memory_space<vmem>>, vector<1x64x128xf32>
    %51 = vector.shape_cast %50 : vector<1x64x128xf32> to vector<64x128xf32>
    %cst_31 = arith.constant dense<0.000000e+00> : vector<8x128xf32>
    %52 = tpu.matmul %49, %51, %cst_31 {dimension_numbers = #tpu.dot_dimension_numbers<[1], [0], [0], [1], [0, 0, 1, 1], [], []>} : vector<8x64xf32>, vector<64x128xf32>, vector<8x128xf32> -> vector<8x128xf32>
    %c0_32 = arith.constant 0 : index
    %c0_33 = arith.constant 0 : index
    %c0_34 = arith.constant 0 : index
    %53 = vector.load %arg7[%c0_32, %c0_33, %c0_34] : memref<1x1x128xf32, #tpu.memory_space<vmem>>, vector<1x1x128xf32>
    %54 = vector.shape_cast %53 : vector<1x1x128xf32> to vector<1x128xf32>
    %55 = vector.broadcast %54 : vector<1x128xf32> to vector<8x128xf32>
    %56 = arith.addf %52, %55 : vector<8x128xf32>
    %57 = vector.extract_strided_slice %56 {offsets = [0, 0], sizes = [8, 32], strides = [1, 1]} : vector<8x128xf32> to vector<8x32xf32>
    %cst_35 = arith.constant 0.000000e+00 : f32
    %58 = vector.broadcast %cst_35 : f32 to vector<8x32xf32>
    %59 = arith.subf %58, %57 : vector<8x32xf32>
    %60 = math.exp %59 : vector<8x32xf32>
    %cst_36 = arith.constant 1.000000e+00 : f32
    %61 = vector.broadcast %cst_36 : f32 to vector<8x32xf32>
    %62 = arith.addf %61, %60 : vector<8x32xf32>
    %cst_37 = arith.constant 1.000000e+00 : f32
    %63 = vector.broadcast %cst_37 : f32 to vector<8x32xf32>
    %64 = arith.divf %63, %62 : vector<8x32xf32>
    %65 = vector.extract_strided_slice %56 {offsets = [0, 32], sizes = [8, 32], strides = [1, 1]} : vector<8x128xf32> to vector<8x32xf32>
    %cst_38 = arith.constant 0.000000e+00 : f32
    %66 = vector.broadcast %cst_38 : f32 to vector<8x32xf32>
    %67 = arith.subf %66, %65 : vector<8x32xf32>
    %68 = math.exp %67 : vector<8x32xf32>
    %cst_39 = arith.constant 1.000000e+00 : f32
    %69 = vector.broadcast %cst_39 : f32 to vector<8x32xf32>
    %70 = arith.addf %69, %68 : vector<8x32xf32>
    %cst_40 = arith.constant 1.000000e+00 : f32
    %71 = vector.broadcast %cst_40 : f32 to vector<8x32xf32>
    %72 = arith.divf %71, %70 : vector<8x32xf32>
    %73 = vector.extract_strided_slice %56 {offsets = [0, 64], sizes = [8, 32], strides = [1, 1]} : vector<8x128xf32> to vector<8x32xf32>
    %74 = math.tanh %73 : vector<8x32xf32>
    %75 = vector.extract_strided_slice %56 {offsets = [0, 96], sizes = [8, 32], strides = [1, 1]} : vector<8x128xf32> to vector<8x32xf32>
    %cst_41 = arith.constant 0.000000e+00 : f32
    %76 = vector.broadcast %cst_41 : f32 to vector<8x32xf32>
    %77 = arith.subf %76, %75 : vector<8x32xf32>
    %78 = math.exp %77 : vector<8x32xf32>
    %cst_42 = arith.constant 1.000000e+00 : f32
    %79 = vector.broadcast %cst_42 : f32 to vector<8x32xf32>
    %80 = arith.addf %79, %78 : vector<8x32xf32>
    %cst_43 = arith.constant 1.000000e+00 : f32
    %81 = vector.broadcast %cst_43 : f32 to vector<8x32xf32>
    %82 = arith.divf %81, %80 : vector<8x32xf32>
    %83 = arith.mulf %72, %7 : vector<8x32xf32>
    %84 = arith.mulf %64, %74 : vector<8x32xf32>
    %85 = arith.addf %83, %84 : vector<8x32xf32>
    %86 = math.tanh %85 : vector<8x32xf32>
    %87 = arith.mulf %82, %86 : vector<8x32xf32>
    %88 = vector.extract_strided_slice %13 {offsets = [8, 0], sizes = [8, 128], strides = [1, 1]} : vector<64x128xf32> to vector<8x128xf32>
    %c0_44 = arith.constant 0 : index
    %c0_45 = arith.constant 0 : index
    %89 = vector.load %arg4[%c0_44, %c0_45] : memref<32x128xf32, #tpu.memory_space<vmem>>, vector<32x128xf32>
    %cst_46 = arith.constant dense<0.000000e+00> : vector<8x128xf32>
    %90 = tpu.matmul %48, %89, %cst_46 {dimension_numbers = #tpu.dot_dimension_numbers<[1], [0], [0], [1], [0, 0, 1, 1], [], []>} : vector<8x32xf32>, vector<32x128xf32>, vector<8x128xf32> -> vector<8x128xf32>
    %91 = arith.addf %88, %90 : vector<8x128xf32>
    %92 = vector.extract_strided_slice %91 {offsets = [0, 0], sizes = [8, 32], strides = [1, 1]} : vector<8x128xf32> to vector<8x32xf32>
    %cst_47 = arith.constant 0.000000e+00 : f32
    %93 = vector.broadcast %cst_47 : f32 to vector<8x32xf32>
    %94 = arith.subf %93, %92 : vector<8x32xf32>
    %95 = math.exp %94 : vector<8x32xf32>
    %cst_48 = arith.constant 1.000000e+00 : f32
    %96 = vector.broadcast %cst_48 : f32 to vector<8x32xf32>
    %97 = arith.addf %96, %95 : vector<8x32xf32>
    %cst_49 = arith.constant 1.000000e+00 : f32
    %98 = vector.broadcast %cst_49 : f32 to vector<8x32xf32>
    %99 = arith.divf %98, %97 : vector<8x32xf32>
    %100 = vector.extract_strided_slice %91 {offsets = [0, 32], sizes = [8, 32], strides = [1, 1]} : vector<8x128xf32> to vector<8x32xf32>
    %cst_50 = arith.constant 0.000000e+00 : f32
    %101 = vector.broadcast %cst_50 : f32 to vector<8x32xf32>
    %102 = arith.subf %101, %100 : vector<8x32xf32>
    %103 = math.exp %102 : vector<8x32xf32>
    %cst_51 = arith.constant 1.000000e+00 : f32
    %104 = vector.broadcast %cst_51 : f32 to vector<8x32xf32>
    %105 = arith.addf %104, %103 : vector<8x32xf32>
    %cst_52 = arith.constant 1.000000e+00 : f32
    %106 = vector.broadcast %cst_52 : f32 to vector<8x32xf32>
    %107 = arith.divf %106, %105 : vector<8x32xf32>
    %108 = vector.extract_strided_slice %91 {offsets = [0, 64], sizes = [8, 32], strides = [1, 1]} : vector<8x128xf32> to vector<8x32xf32>
    %109 = math.tanh %108 : vector<8x32xf32>
    %110 = vector.extract_strided_slice %91 {offsets = [0, 96], sizes = [8, 32], strides = [1, 1]} : vector<8x128xf32> to vector<8x32xf32>
    %cst_53 = arith.constant 0.000000e+00 : f32
    %111 = vector.broadcast %cst_53 : f32 to vector<8x32xf32>
    %112 = arith.subf %111, %110 : vector<8x32xf32>
    %113 = math.exp %112 : vector<8x32xf32>
    %cst_54 = arith.constant 1.000000e+00 : f32
    %114 = vector.broadcast %cst_54 : f32 to vector<8x32xf32>
    %115 = arith.addf %114, %113 : vector<8x32xf32>
    %cst_55 = arith.constant 1.000000e+00 : f32
    %116 = vector.broadcast %cst_55 : f32 to vector<8x32xf32>
    %117 = arith.divf %116, %115 : vector<8x32xf32>
    %118 = arith.mulf %107, %46 : vector<8x32xf32>
    %119 = arith.mulf %99, %109 : vector<8x32xf32>
    %120 = arith.addf %118, %119 : vector<8x32xf32>
    %121 = math.tanh %120 : vector<8x32xf32>
    %122 = arith.mulf %117, %121 : vector<8x32xf32>
    %123 = tpu.concatenate %122, %87 in 1 : vector<8x32xf32>, vector<8x32xf32> -> vector<8x64xf32>
    %c0_56 = arith.constant 0 : index
    %c0_57 = arith.constant 0 : index
    %c0_58 = arith.constant 0 : index
    %124 = vector.load %arg6[%c0_56, %c0_57, %c0_58] : memref<1x64x128xf32, #tpu.memory_space<vmem>>, vector<1x64x128xf32>
    %125 = vector.shape_cast %124 : vector<1x64x128xf32> to vector<64x128xf32>
    %cst_59 = arith.constant dense<0.000000e+00> : vector<8x128xf32>
    %126 = tpu.matmul %123, %125, %cst_59 {dimension_numbers = #tpu.dot_dimension_numbers<[1], [0], [0], [1], [0, 0, 1, 1], [], []>} : vector<8x64xf32>, vector<64x128xf32>, vector<8x128xf32> -> vector<8x128xf32>
    %c0_60 = arith.constant 0 : index
    %c0_61 = arith.constant 0 : index
    %c0_62 = arith.constant 0 : index
    %127 = vector.load %arg7[%c0_60, %c0_61, %c0_62] : memref<1x1x128xf32, #tpu.memory_space<vmem>>, vector<1x1x128xf32>
    %128 = vector.shape_cast %127 : vector<1x1x128xf32> to vector<1x128xf32>
    %129 = vector.broadcast %128 : vector<1x128xf32> to vector<8x128xf32>
    %130 = arith.addf %126, %129 : vector<8x128xf32>
    %131 = vector.extract_strided_slice %130 {offsets = [0, 0], sizes = [8, 32], strides = [1, 1]} : vector<8x128xf32> to vector<8x32xf32>
    %cst_63 = arith.constant 0.000000e+00 : f32
    %132 = vector.broadcast %cst_63 : f32 to vector<8x32xf32>
    %133 = arith.subf %132, %131 : vector<8x32xf32>
    %134 = math.exp %133 : vector<8x32xf32>
    %cst_64 = arith.constant 1.000000e+00 : f32
    %135 = vector.broadcast %cst_64 : f32 to vector<8x32xf32>
    %136 = arith.addf %135, %134 : vector<8x32xf32>
    %cst_65 = arith.constant 1.000000e+00 : f32
    %137 = vector.broadcast %cst_65 : f32 to vector<8x32xf32>
    %138 = arith.divf %137, %136 : vector<8x32xf32>
    %139 = vector.extract_strided_slice %130 {offsets = [0, 32], sizes = [8, 32], strides = [1, 1]} : vector<8x128xf32> to vector<8x32xf32>
    %cst_66 = arith.constant 0.000000e+00 : f32
    %140 = vector.broadcast %cst_66 : f32 to vector<8x32xf32>
    %141 = arith.subf %140, %139 : vector<8x32xf32>
    %142 = math.exp %141 : vector<8x32xf32>
    %cst_67 = arith.constant 1.000000e+00 : f32
    %143 = vector.broadcast %cst_67 : f32 to vector<8x32xf32>
    %144 = arith.addf %143, %142 : vector<8x32xf32>
    %cst_68 = arith.constant 1.000000e+00 : f32
    %145 = vector.broadcast %cst_68 : f32 to vector<8x32xf32>
    %146 = arith.divf %145, %144 : vector<8x32xf32>
    %147 = vector.extract_strided_slice %130 {offsets = [0, 64], sizes = [8, 32], strides = [1, 1]} : vector<8x128xf32> to vector<8x32xf32>
    %148 = math.tanh %147 : vector<8x32xf32>
    %149 = vector.extract_strided_slice %130 {offsets = [0, 96], sizes = [8, 32], strides = [1, 1]} : vector<8x128xf32> to vector<8x32xf32>
    %cst_69 = arith.constant 0.000000e+00 : f32
    %150 = vector.broadcast %cst_69 : f32 to vector<8x32xf32>
    %151 = arith.subf %150, %149 : vector<8x32xf32>
    %152 = math.exp %151 : vector<8x32xf32>
    %cst_70 = arith.constant 1.000000e+00 : f32
    %153 = vector.broadcast %cst_70 : f32 to vector<8x32xf32>
    %154 = arith.addf %153, %152 : vector<8x32xf32>
    %cst_71 = arith.constant 1.000000e+00 : f32
    %155 = vector.broadcast %cst_71 : f32 to vector<8x32xf32>
    %156 = arith.divf %155, %154 : vector<8x32xf32>
    %157 = arith.mulf %146, %85 : vector<8x32xf32>
    %158 = arith.mulf %138, %148 : vector<8x32xf32>
    %159 = arith.addf %157, %158 : vector<8x32xf32>
    %160 = math.tanh %159 : vector<8x32xf32>
    %161 = arith.mulf %156, %160 : vector<8x32xf32>
    %162 = vector.extract_strided_slice %13 {offsets = [16, 0], sizes = [8, 128], strides = [1, 1]} : vector<64x128xf32> to vector<8x128xf32>
    %c0_72 = arith.constant 0 : index
    %c0_73 = arith.constant 0 : index
    %163 = vector.load %arg4[%c0_72, %c0_73] : memref<32x128xf32, #tpu.memory_space<vmem>>, vector<32x128xf32>
    %cst_74 = arith.constant dense<0.000000e+00> : vector<8x128xf32>
    %164 = tpu.matmul %122, %163, %cst_74 {dimension_numbers = #tpu.dot_dimension_numbers<[1], [0], [0], [1], [0, 0, 1, 1], [], []>} : vector<8x32xf32>, vector<32x128xf32>, vector<8x128xf32> -> vector<8x128xf32>
    %165 = arith.addf %162, %164 : vector<8x128xf32>
    %166 = vector.extract_strided_slice %165 {offsets = [0, 0], sizes = [8, 32], strides = [1, 1]} : vector<8x128xf32> to vector<8x32xf32>
    %cst_75 = arith.constant 0.000000e+00 : f32
    %167 = vector.broadcast %cst_75 : f32 to vector<8x32xf32>
    %168 = arith.subf %167, %166 : vector<8x32xf32>
    %169 = math.exp %168 : vector<8x32xf32>
    %cst_76 = arith.constant 1.000000e+00 : f32
    %170 = vector.broadcast %cst_76 : f32 to vector<8x32xf32>
    %171 = arith.addf %170, %169 : vector<8x32xf32>
    %cst_77 = arith.constant 1.000000e+00 : f32
    %172 = vector.broadcast %cst_77 : f32 to vector<8x32xf32>
    %173 = arith.divf %172, %171 : vector<8x32xf32>
    %174 = vector.extract_strided_slice %165 {offsets = [0, 32], sizes = [8, 32], strides = [1, 1]} : vector<8x128xf32> to vector<8x32xf32>
    %cst_78 = arith.constant 0.000000e+00 : f32
    %175 = vector.broadcast %cst_78 : f32 to vector<8x32xf32>
    %176 = arith.subf %175, %174 : vector<8x32xf32>
    %177 = math.exp %176 : vector<8x32xf32>
    %cst_79 = arith.constant 1.000000e+00 : f32
    %178 = vector.broadcast %cst_79 : f32 to vector<8x32xf32>
    %179 = arith.addf %178, %177 : vector<8x32xf32>
    %cst_80 = arith.constant 1.000000e+00 : f32
    %180 = vector.broadcast %cst_80 : f32 to vector<8x32xf32>
    %181 = arith.divf %180, %179 : vector<8x32xf32>
    %182 = vector.extract_strided_slice %165 {offsets = [0, 64], sizes = [8, 32], strides = [1, 1]} : vector<8x128xf32> to vector<8x32xf32>
    %183 = math.tanh %182 : vector<8x32xf32>
    %184 = vector.extract_strided_slice %165 {offsets = [0, 96], sizes = [8, 32], strides = [1, 1]} : vector<8x128xf32> to vector<8x32xf32>
    %cst_81 = arith.constant 0.000000e+00 : f32
    %185 = vector.broadcast %cst_81 : f32 to vector<8x32xf32>
    %186 = arith.subf %185, %184 : vector<8x32xf32>
    %187 = math.exp %186 : vector<8x32xf32>
    %cst_82 = arith.constant 1.000000e+00 : f32
    %188 = vector.broadcast %cst_82 : f32 to vector<8x32xf32>
    %189 = arith.addf %188, %187 : vector<8x32xf32>
    %cst_83 = arith.constant 1.000000e+00 : f32
    %190 = vector.broadcast %cst_83 : f32 to vector<8x32xf32>
    %191 = arith.divf %190, %189 : vector<8x32xf32>
    %192 = arith.mulf %181, %120 : vector<8x32xf32>
    %193 = arith.mulf %173, %183 : vector<8x32xf32>
    %194 = arith.addf %192, %193 : vector<8x32xf32>
    %195 = math.tanh %194 : vector<8x32xf32>
    %196 = arith.mulf %191, %195 : vector<8x32xf32>
    %197 = tpu.concatenate %196, %161 in 1 : vector<8x32xf32>, vector<8x32xf32> -> vector<8x64xf32>
    %c0_84 = arith.constant 0 : index
    %c0_85 = arith.constant 0 : index
    %c0_86 = arith.constant 0 : index
    %198 = vector.load %arg6[%c0_84, %c0_85, %c0_86] : memref<1x64x128xf32, #tpu.memory_space<vmem>>, vector<1x64x128xf32>
    %199 = vector.shape_cast %198 : vector<1x64x128xf32> to vector<64x128xf32>
    %cst_87 = arith.constant dense<0.000000e+00> : vector<8x128xf32>
    %200 = tpu.matmul %197, %199, %cst_87 {dimension_numbers = #tpu.dot_dimension_numbers<[1], [0], [0], [1], [0, 0, 1, 1], [], []>} : vector<8x64xf32>, vector<64x128xf32>, vector<8x128xf32> -> vector<8x128xf32>
    %c0_88 = arith.constant 0 : index
    %c0_89 = arith.constant 0 : index
    %c0_90 = arith.constant 0 : index
    %201 = vector.load %arg7[%c0_88, %c0_89, %c0_90] : memref<1x1x128xf32, #tpu.memory_space<vmem>>, vector<1x1x128xf32>
    %202 = vector.shape_cast %201 : vector<1x1x128xf32> to vector<1x128xf32>
    %203 = vector.broadcast %202 : vector<1x128xf32> to vector<8x128xf32>
    %204 = arith.addf %200, %203 : vector<8x128xf32>
    %205 = vector.extract_strided_slice %204 {offsets = [0, 0], sizes = [8, 32], strides = [1, 1]} : vector<8x128xf32> to vector<8x32xf32>
    %cst_91 = arith.constant 0.000000e+00 : f32
    %206 = vector.broadcast %cst_91 : f32 to vector<8x32xf32>
    %207 = arith.subf %206, %205 : vector<8x32xf32>
    %208 = math.exp %207 : vector<8x32xf32>
    %cst_92 = arith.constant 1.000000e+00 : f32
    %209 = vector.broadcast %cst_92 : f32 to vector<8x32xf32>
    %210 = arith.addf %209, %208 : vector<8x32xf32>
    %cst_93 = arith.constant 1.000000e+00 : f32
    %211 = vector.broadcast %cst_93 : f32 to vector<8x32xf32>
    %212 = arith.divf %211, %210 : vector<8x32xf32>
    %213 = vector.extract_strided_slice %204 {offsets = [0, 32], sizes = [8, 32], strides = [1, 1]} : vector<8x128xf32> to vector<8x32xf32>
    %cst_94 = arith.constant 0.000000e+00 : f32
    %214 = vector.broadcast %cst_94 : f32 to vector<8x32xf32>
    %215 = arith.subf %214, %213 : vector<8x32xf32>
    %216 = math.exp %215 : vector<8x32xf32>
    %cst_95 = arith.constant 1.000000e+00 : f32
    %217 = vector.broadcast %cst_95 : f32 to vector<8x32xf32>
    %218 = arith.addf %217, %216 : vector<8x32xf32>
    %cst_96 = arith.constant 1.000000e+00 : f32
    %219 = vector.broadcast %cst_96 : f32 to vector<8x32xf32>
    %220 = arith.divf %219, %218 : vector<8x32xf32>
    %221 = vector.extract_strided_slice %204 {offsets = [0, 64], sizes = [8, 32], strides = [1, 1]} : vector<8x128xf32> to vector<8x32xf32>
    %222 = math.tanh %221 : vector<8x32xf32>
    %223 = vector.extract_strided_slice %204 {offsets = [0, 96], sizes = [8, 32], strides = [1, 1]} : vector<8x128xf32> to vector<8x32xf32>
    %cst_97 = arith.constant 0.000000e+00 : f32
    %224 = vector.broadcast %cst_97 : f32 to vector<8x32xf32>
    %225 = arith.subf %224, %223 : vector<8x32xf32>
    %226 = math.exp %225 : vector<8x32xf32>
    %cst_98 = arith.constant 1.000000e+00 : f32
    %227 = vector.broadcast %cst_98 : f32 to vector<8x32xf32>
    %228 = arith.addf %227, %226 : vector<8x32xf32>
    %cst_99 = arith.constant 1.000000e+00 : f32
    %229 = vector.broadcast %cst_99 : f32 to vector<8x32xf32>
    %230 = arith.divf %229, %228 : vector<8x32xf32>
    %231 = arith.mulf %220, %159 : vector<8x32xf32>
    %232 = arith.mulf %212, %222 : vector<8x32xf32>
    %233 = arith.addf %231, %232 : vector<8x32xf32>
    %234 = math.tanh %233 : vector<8x32xf32>
    %235 = arith.mulf %230, %234 : vector<8x32xf32>
    %236 = vector.extract_strided_slice %13 {offsets = [24, 0], sizes = [8, 128], strides = [1, 1]} : vector<64x128xf32> to vector<8x128xf32>
    %c0_100 = arith.constant 0 : index
    %c0_101 = arith.constant 0 : index
    %237 = vector.load %arg4[%c0_100, %c0_101] : memref<32x128xf32, #tpu.memory_space<vmem>>, vector<32x128xf32>
    %cst_102 = arith.constant dense<0.000000e+00> : vector<8x128xf32>
    %238 = tpu.matmul %196, %237, %cst_102 {dimension_numbers = #tpu.dot_dimension_numbers<[1], [0], [0], [1], [0, 0, 1, 1], [], []>} : vector<8x32xf32>, vector<32x128xf32>, vector<8x128xf32> -> vector<8x128xf32>
    %239 = arith.addf %236, %238 : vector<8x128xf32>
    %240 = vector.extract_strided_slice %239 {offsets = [0, 0], sizes = [8, 32], strides = [1, 1]} : vector<8x128xf32> to vector<8x32xf32>
    %cst_103 = arith.constant 0.000000e+00 : f32
    %241 = vector.broadcast %cst_103 : f32 to vector<8x32xf32>
    %242 = arith.subf %241, %240 : vector<8x32xf32>
    %243 = math.exp %242 : vector<8x32xf32>
    %cst_104 = arith.constant 1.000000e+00 : f32
    %244 = vector.broadcast %cst_104 : f32 to vector<8x32xf32>
    %245 = arith.addf %244, %243 : vector<8x32xf32>
    %cst_105 = arith.constant 1.000000e+00 : f32
    %246 = vector.broadcast %cst_105 : f32 to vector<8x32xf32>
    %247 = arith.divf %246, %245 : vector<8x32xf32>
    %248 = vector.extract_strided_slice %239 {offsets = [0, 32], sizes = [8, 32], strides = [1, 1]} : vector<8x128xf32> to vector<8x32xf32>
    %cst_106 = arith.constant 0.000000e+00 : f32
    %249 = vector.broadcast %cst_106 : f32 to vector<8x32xf32>
    %250 = arith.subf %249, %248 : vector<8x32xf32>
    %251 = math.exp %250 : vector<8x32xf32>
    %cst_107 = arith.constant 1.000000e+00 : f32
    %252 = vector.broadcast %cst_107 : f32 to vector<8x32xf32>
    %253 = arith.addf %252, %251 : vector<8x32xf32>
    %cst_108 = arith.constant 1.000000e+00 : f32
    %254 = vector.broadcast %cst_108 : f32 to vector<8x32xf32>
    %255 = arith.divf %254, %253 : vector<8x32xf32>
    %256 = vector.extract_strided_slice %239 {offsets = [0, 64], sizes = [8, 32], strides = [1, 1]} : vector<8x128xf32> to vector<8x32xf32>
    %257 = math.tanh %256 : vector<8x32xf32>
    %258 = vector.extract_strided_slice %239 {offsets = [0, 96], sizes = [8, 32], strides = [1, 1]} : vector<8x128xf32> to vector<8x32xf32>
    %cst_109 = arith.constant 0.000000e+00 : f32
    %259 = vector.broadcast %cst_109 : f32 to vector<8x32xf32>
    %260 = arith.subf %259, %258 : vector<8x32xf32>
    %261 = math.exp %260 : vector<8x32xf32>
    %cst_110 = arith.constant 1.000000e+00 : f32
    %262 = vector.broadcast %cst_110 : f32 to vector<8x32xf32>
    %263 = arith.addf %262, %261 : vector<8x32xf32>
    %cst_111 = arith.constant 1.000000e+00 : f32
    %264 = vector.broadcast %cst_111 : f32 to vector<8x32xf32>
    %265 = arith.divf %264, %263 : vector<8x32xf32>
    %266 = arith.mulf %255, %194 : vector<8x32xf32>
    %267 = arith.mulf %247, %257 : vector<8x32xf32>
    %268 = arith.addf %266, %267 : vector<8x32xf32>
    %269 = math.tanh %268 : vector<8x32xf32>
    %270 = arith.mulf %265, %269 : vector<8x32xf32>
    %271 = tpu.concatenate %270, %235 in 1 : vector<8x32xf32>, vector<8x32xf32> -> vector<8x64xf32>
    %c0_112 = arith.constant 0 : index
    %c0_113 = arith.constant 0 : index
    %c0_114 = arith.constant 0 : index
    %272 = vector.load %arg6[%c0_112, %c0_113, %c0_114] : memref<1x64x128xf32, #tpu.memory_space<vmem>>, vector<1x64x128xf32>
    %273 = vector.shape_cast %272 : vector<1x64x128xf32> to vector<64x128xf32>
    %cst_115 = arith.constant dense<0.000000e+00> : vector<8x128xf32>
    %274 = tpu.matmul %271, %273, %cst_115 {dimension_numbers = #tpu.dot_dimension_numbers<[1], [0], [0], [1], [0, 0, 1, 1], [], []>} : vector<8x64xf32>, vector<64x128xf32>, vector<8x128xf32> -> vector<8x128xf32>
    %c0_116 = arith.constant 0 : index
    %c0_117 = arith.constant 0 : index
    %c0_118 = arith.constant 0 : index
    %275 = vector.load %arg7[%c0_116, %c0_117, %c0_118] : memref<1x1x128xf32, #tpu.memory_space<vmem>>, vector<1x1x128xf32>
    %276 = vector.shape_cast %275 : vector<1x1x128xf32> to vector<1x128xf32>
    %277 = vector.broadcast %276 : vector<1x128xf32> to vector<8x128xf32>
    %278 = arith.addf %274, %277 : vector<8x128xf32>
    %279 = vector.extract_strided_slice %278 {offsets = [0, 0], sizes = [8, 32], strides = [1, 1]} : vector<8x128xf32> to vector<8x32xf32>
    %cst_119 = arith.constant 0.000000e+00 : f32
    %280 = vector.broadcast %cst_119 : f32 to vector<8x32xf32>
    %281 = arith.subf %280, %279 : vector<8x32xf32>
    %282 = math.exp %281 : vector<8x32xf32>
    %cst_120 = arith.constant 1.000000e+00 : f32
    %283 = vector.broadcast %cst_120 : f32 to vector<8x32xf32>
    %284 = arith.addf %283, %282 : vector<8x32xf32>
    %cst_121 = arith.constant 1.000000e+00 : f32
    %285 = vector.broadcast %cst_121 : f32 to vector<8x32xf32>
    %286 = arith.divf %285, %284 : vector<8x32xf32>
    %287 = vector.extract_strided_slice %278 {offsets = [0, 32], sizes = [8, 32], strides = [1, 1]} : vector<8x128xf32> to vector<8x32xf32>
    %cst_122 = arith.constant 0.000000e+00 : f32
    %288 = vector.broadcast %cst_122 : f32 to vector<8x32xf32>
    %289 = arith.subf %288, %287 : vector<8x32xf32>
    %290 = math.exp %289 : vector<8x32xf32>
    %cst_123 = arith.constant 1.000000e+00 : f32
    %291 = vector.broadcast %cst_123 : f32 to vector<8x32xf32>
    %292 = arith.addf %291, %290 : vector<8x32xf32>
    %cst_124 = arith.constant 1.000000e+00 : f32
    %293 = vector.broadcast %cst_124 : f32 to vector<8x32xf32>
    %294 = arith.divf %293, %292 : vector<8x32xf32>
    %295 = vector.extract_strided_slice %278 {offsets = [0, 64], sizes = [8, 32], strides = [1, 1]} : vector<8x128xf32> to vector<8x32xf32>
    %296 = math.tanh %295 : vector<8x32xf32>
    %297 = vector.extract_strided_slice %278 {offsets = [0, 96], sizes = [8, 32], strides = [1, 1]} : vector<8x128xf32> to vector<8x32xf32>
    %cst_125 = arith.constant 0.000000e+00 : f32
    %298 = vector.broadcast %cst_125 : f32 to vector<8x32xf32>
    %299 = arith.subf %298, %297 : vector<8x32xf32>
    %300 = math.exp %299 : vector<8x32xf32>
    %cst_126 = arith.constant 1.000000e+00 : f32
    %301 = vector.broadcast %cst_126 : f32 to vector<8x32xf32>
    %302 = arith.addf %301, %300 : vector<8x32xf32>
    %cst_127 = arith.constant 1.000000e+00 : f32
    %303 = vector.broadcast %cst_127 : f32 to vector<8x32xf32>
    %304 = arith.divf %303, %302 : vector<8x32xf32>
    %305 = arith.mulf %294, %233 : vector<8x32xf32>
    %306 = arith.mulf %286, %296 : vector<8x32xf32>
    %307 = arith.addf %305, %306 : vector<8x32xf32>
    %308 = math.tanh %307 : vector<8x32xf32>
    %309 = arith.mulf %304, %308 : vector<8x32xf32>
    %310 = vector.extract_strided_slice %13 {offsets = [32, 0], sizes = [8, 128], strides = [1, 1]} : vector<64x128xf32> to vector<8x128xf32>
    %c0_128 = arith.constant 0 : index
    %c0_129 = arith.constant 0 : index
    %311 = vector.load %arg4[%c0_128, %c0_129] : memref<32x128xf32, #tpu.memory_space<vmem>>, vector<32x128xf32>
    %cst_130 = arith.constant dense<0.000000e+00> : vector<8x128xf32>
    %312 = tpu.matmul %270, %311, %cst_130 {dimension_numbers = #tpu.dot_dimension_numbers<[1], [0], [0], [1], [0, 0, 1, 1], [], []>} : vector<8x32xf32>, vector<32x128xf32>, vector<8x128xf32> -> vector<8x128xf32>
    %313 = arith.addf %310, %312 : vector<8x128xf32>
    %314 = vector.extract_strided_slice %313 {offsets = [0, 0], sizes = [8, 32], strides = [1, 1]} : vector<8x128xf32> to vector<8x32xf32>
    %cst_131 = arith.constant 0.000000e+00 : f32
    %315 = vector.broadcast %cst_131 : f32 to vector<8x32xf32>
    %316 = arith.subf %315, %314 : vector<8x32xf32>
    %317 = math.exp %316 : vector<8x32xf32>
    %cst_132 = arith.constant 1.000000e+00 : f32
    %318 = vector.broadcast %cst_132 : f32 to vector<8x32xf32>
    %319 = arith.addf %318, %317 : vector<8x32xf32>
    %cst_133 = arith.constant 1.000000e+00 : f32
    %320 = vector.broadcast %cst_133 : f32 to vector<8x32xf32>
    %321 = arith.divf %320, %319 : vector<8x32xf32>
    %322 = vector.extract_strided_slice %313 {offsets = [0, 32], sizes = [8, 32], strides = [1, 1]} : vector<8x128xf32> to vector<8x32xf32>
    %cst_134 = arith.constant 0.000000e+00 : f32
    %323 = vector.broadcast %cst_134 : f32 to vector<8x32xf32>
    %324 = arith.subf %323, %322 : vector<8x32xf32>
    %325 = math.exp %324 : vector<8x32xf32>
    %cst_135 = arith.constant 1.000000e+00 : f32
    %326 = vector.broadcast %cst_135 : f32 to vector<8x32xf32>
    %327 = arith.addf %326, %325 : vector<8x32xf32>
    %cst_136 = arith.constant 1.000000e+00 : f32
    %328 = vector.broadcast %cst_136 : f32 to vector<8x32xf32>
    %329 = arith.divf %328, %327 : vector<8x32xf32>
    %330 = vector.extract_strided_slice %313 {offsets = [0, 64], sizes = [8, 32], strides = [1, 1]} : vector<8x128xf32> to vector<8x32xf32>
    %331 = math.tanh %330 : vector<8x32xf32>
    %332 = vector.extract_strided_slice %313 {offsets = [0, 96], sizes = [8, 32], strides = [1, 1]} : vector<8x128xf32> to vector<8x32xf32>
    %cst_137 = arith.constant 0.000000e+00 : f32
    %333 = vector.broadcast %cst_137 : f32 to vector<8x32xf32>
    %334 = arith.subf %333, %332 : vector<8x32xf32>
    %335 = math.exp %334 : vector<8x32xf32>
    %cst_138 = arith.constant 1.000000e+00 : f32
    %336 = vector.broadcast %cst_138 : f32 to vector<8x32xf32>
    %337 = arith.addf %336, %335 : vector<8x32xf32>
    %cst_139 = arith.constant 1.000000e+00 : f32
    %338 = vector.broadcast %cst_139 : f32 to vector<8x32xf32>
    %339 = arith.divf %338, %337 : vector<8x32xf32>
    %340 = arith.mulf %329, %268 : vector<8x32xf32>
    %341 = arith.mulf %321, %331 : vector<8x32xf32>
    %342 = arith.addf %340, %341 : vector<8x32xf32>
    %343 = math.tanh %342 : vector<8x32xf32>
    %344 = arith.mulf %339, %343 : vector<8x32xf32>
    %345 = tpu.concatenate %344, %309 in 1 : vector<8x32xf32>, vector<8x32xf32> -> vector<8x64xf32>
    %c0_140 = arith.constant 0 : index
    %c0_141 = arith.constant 0 : index
    %c0_142 = arith.constant 0 : index
    %346 = vector.load %arg6[%c0_140, %c0_141, %c0_142] : memref<1x64x128xf32, #tpu.memory_space<vmem>>, vector<1x64x128xf32>
    %347 = vector.shape_cast %346 : vector<1x64x128xf32> to vector<64x128xf32>
    %cst_143 = arith.constant dense<0.000000e+00> : vector<8x128xf32>
    %348 = tpu.matmul %345, %347, %cst_143 {dimension_numbers = #tpu.dot_dimension_numbers<[1], [0], [0], [1], [0, 0, 1, 1], [], []>} : vector<8x64xf32>, vector<64x128xf32>, vector<8x128xf32> -> vector<8x128xf32>
    %c0_144 = arith.constant 0 : index
    %c0_145 = arith.constant 0 : index
    %c0_146 = arith.constant 0 : index
    %349 = vector.load %arg7[%c0_144, %c0_145, %c0_146] : memref<1x1x128xf32, #tpu.memory_space<vmem>>, vector<1x1x128xf32>
    %350 = vector.shape_cast %349 : vector<1x1x128xf32> to vector<1x128xf32>
    %351 = vector.broadcast %350 : vector<1x128xf32> to vector<8x128xf32>
    %352 = arith.addf %348, %351 : vector<8x128xf32>
    %353 = vector.extract_strided_slice %352 {offsets = [0, 0], sizes = [8, 32], strides = [1, 1]} : vector<8x128xf32> to vector<8x32xf32>
    %cst_147 = arith.constant 0.000000e+00 : f32
    %354 = vector.broadcast %cst_147 : f32 to vector<8x32xf32>
    %355 = arith.subf %354, %353 : vector<8x32xf32>
    %356 = math.exp %355 : vector<8x32xf32>
    %cst_148 = arith.constant 1.000000e+00 : f32
    %357 = vector.broadcast %cst_148 : f32 to vector<8x32xf32>
    %358 = arith.addf %357, %356 : vector<8x32xf32>
    %cst_149 = arith.constant 1.000000e+00 : f32
    %359 = vector.broadcast %cst_149 : f32 to vector<8x32xf32>
    %360 = arith.divf %359, %358 : vector<8x32xf32>
    %361 = vector.extract_strided_slice %352 {offsets = [0, 32], sizes = [8, 32], strides = [1, 1]} : vector<8x128xf32> to vector<8x32xf32>
    %cst_150 = arith.constant 0.000000e+00 : f32
    %362 = vector.broadcast %cst_150 : f32 to vector<8x32xf32>
    %363 = arith.subf %362, %361 : vector<8x32xf32>
    %364 = math.exp %363 : vector<8x32xf32>
    %cst_151 = arith.constant 1.000000e+00 : f32
    %365 = vector.broadcast %cst_151 : f32 to vector<8x32xf32>
    %366 = arith.addf %365, %364 : vector<8x32xf32>
    %cst_152 = arith.constant 1.000000e+00 : f32
    %367 = vector.broadcast %cst_152 : f32 to vector<8x32xf32>
    %368 = arith.divf %367, %366 : vector<8x32xf32>
    %369 = vector.extract_strided_slice %352 {offsets = [0, 64], sizes = [8, 32], strides = [1, 1]} : vector<8x128xf32> to vector<8x32xf32>
    %370 = math.tanh %369 : vector<8x32xf32>
    %371 = vector.extract_strided_slice %352 {offsets = [0, 96], sizes = [8, 32], strides = [1, 1]} : vector<8x128xf32> to vector<8x32xf32>
    %cst_153 = arith.constant 0.000000e+00 : f32
    %372 = vector.broadcast %cst_153 : f32 to vector<8x32xf32>
    %373 = arith.subf %372, %371 : vector<8x32xf32>
    %374 = math.exp %373 : vector<8x32xf32>
    %cst_154 = arith.constant 1.000000e+00 : f32
    %375 = vector.broadcast %cst_154 : f32 to vector<8x32xf32>
    %376 = arith.addf %375, %374 : vector<8x32xf32>
    %cst_155 = arith.constant 1.000000e+00 : f32
    %377 = vector.broadcast %cst_155 : f32 to vector<8x32xf32>
    %378 = arith.divf %377, %376 : vector<8x32xf32>
    %379 = arith.mulf %368, %307 : vector<8x32xf32>
    %380 = arith.mulf %360, %370 : vector<8x32xf32>
    %381 = arith.addf %379, %380 : vector<8x32xf32>
    %382 = math.tanh %381 : vector<8x32xf32>
    %383 = arith.mulf %378, %382 : vector<8x32xf32>
    %384 = vector.extract_strided_slice %13 {offsets = [40, 0], sizes = [8, 128], strides = [1, 1]} : vector<64x128xf32> to vector<8x128xf32>
    %c0_156 = arith.constant 0 : index
    %c0_157 = arith.constant 0 : index
    %385 = vector.load %arg4[%c0_156, %c0_157] : memref<32x128xf32, #tpu.memory_space<vmem>>, vector<32x128xf32>
    %cst_158 = arith.constant dense<0.000000e+00> : vector<8x128xf32>
    %386 = tpu.matmul %344, %385, %cst_158 {dimension_numbers = #tpu.dot_dimension_numbers<[1], [0], [0], [1], [0, 0, 1, 1], [], []>} : vector<8x32xf32>, vector<32x128xf32>, vector<8x128xf32> -> vector<8x128xf32>
    %387 = arith.addf %384, %386 : vector<8x128xf32>
    %388 = vector.extract_strided_slice %387 {offsets = [0, 0], sizes = [8, 32], strides = [1, 1]} : vector<8x128xf32> to vector<8x32xf32>
    %cst_159 = arith.constant 0.000000e+00 : f32
    %389 = vector.broadcast %cst_159 : f32 to vector<8x32xf32>
    %390 = arith.subf %389, %388 : vector<8x32xf32>
    %391 = math.exp %390 : vector<8x32xf32>
    %cst_160 = arith.constant 1.000000e+00 : f32
    %392 = vector.broadcast %cst_160 : f32 to vector<8x32xf32>
    %393 = arith.addf %392, %391 : vector<8x32xf32>
    %cst_161 = arith.constant 1.000000e+00 : f32
    %394 = vector.broadcast %cst_161 : f32 to vector<8x32xf32>
    %395 = arith.divf %394, %393 : vector<8x32xf32>
    %396 = vector.extract_strided_slice %387 {offsets = [0, 32], sizes = [8, 32], strides = [1, 1]} : vector<8x128xf32> to vector<8x32xf32>
    %cst_162 = arith.constant 0.000000e+00 : f32
    %397 = vector.broadcast %cst_162 : f32 to vector<8x32xf32>
    %398 = arith.subf %397, %396 : vector<8x32xf32>
    %399 = math.exp %398 : vector<8x32xf32>
    %cst_163 = arith.constant 1.000000e+00 : f32
    %400 = vector.broadcast %cst_163 : f32 to vector<8x32xf32>
    %401 = arith.addf %400, %399 : vector<8x32xf32>
    %cst_164 = arith.constant 1.000000e+00 : f32
    %402 = vector.broadcast %cst_164 : f32 to vector<8x32xf32>
    %403 = arith.divf %402, %401 : vector<8x32xf32>
    %404 = vector.extract_strided_slice %387 {offsets = [0, 64], sizes = [8, 32], strides = [1, 1]} : vector<8x128xf32> to vector<8x32xf32>
    %405 = math.tanh %404 : vector<8x32xf32>
    %406 = vector.extract_strided_slice %387 {offsets = [0, 96], sizes = [8, 32], strides = [1, 1]} : vector<8x128xf32> to vector<8x32xf32>
    %cst_165 = arith.constant 0.000000e+00 : f32
    %407 = vector.broadcast %cst_165 : f32 to vector<8x32xf32>
    %408 = arith.subf %407, %406 : vector<8x32xf32>
    %409 = math.exp %408 : vector<8x32xf32>
    %cst_166 = arith.constant 1.000000e+00 : f32
    %410 = vector.broadcast %cst_166 : f32 to vector<8x32xf32>
    %411 = arith.addf %410, %409 : vector<8x32xf32>
    %cst_167 = arith.constant 1.000000e+00 : f32
    %412 = vector.broadcast %cst_167 : f32 to vector<8x32xf32>
    %413 = arith.divf %412, %411 : vector<8x32xf32>
    %414 = arith.mulf %403, %342 : vector<8x32xf32>
    %415 = arith.mulf %395, %405 : vector<8x32xf32>
    %416 = arith.addf %414, %415 : vector<8x32xf32>
    %417 = math.tanh %416 : vector<8x32xf32>
    %418 = arith.mulf %413, %417 : vector<8x32xf32>
    %419 = tpu.concatenate %418, %383 in 1 : vector<8x32xf32>, vector<8x32xf32> -> vector<8x64xf32>
    %c0_168 = arith.constant 0 : index
    %c0_169 = arith.constant 0 : index
    %c0_170 = arith.constant 0 : index
    %420 = vector.load %arg6[%c0_168, %c0_169, %c0_170] : memref<1x64x128xf32, #tpu.memory_space<vmem>>, vector<1x64x128xf32>
    %421 = vector.shape_cast %420 : vector<1x64x128xf32> to vector<64x128xf32>
    %cst_171 = arith.constant dense<0.000000e+00> : vector<8x128xf32>
    %422 = tpu.matmul %419, %421, %cst_171 {dimension_numbers = #tpu.dot_dimension_numbers<[1], [0], [0], [1], [0, 0, 1, 1], [], []>} : vector<8x64xf32>, vector<64x128xf32>, vector<8x128xf32> -> vector<8x128xf32>
    %c0_172 = arith.constant 0 : index
    %c0_173 = arith.constant 0 : index
    %c0_174 = arith.constant 0 : index
    %423 = vector.load %arg7[%c0_172, %c0_173, %c0_174] : memref<1x1x128xf32, #tpu.memory_space<vmem>>, vector<1x1x128xf32>
    %424 = vector.shape_cast %423 : vector<1x1x128xf32> to vector<1x128xf32>
    %425 = vector.broadcast %424 : vector<1x128xf32> to vector<8x128xf32>
    %426 = arith.addf %422, %425 : vector<8x128xf32>
    %427 = vector.extract_strided_slice %426 {offsets = [0, 0], sizes = [8, 32], strides = [1, 1]} : vector<8x128xf32> to vector<8x32xf32>
    %cst_175 = arith.constant 0.000000e+00 : f32
    %428 = vector.broadcast %cst_175 : f32 to vector<8x32xf32>
    %429 = arith.subf %428, %427 : vector<8x32xf32>
    %430 = math.exp %429 : vector<8x32xf32>
    %cst_176 = arith.constant 1.000000e+00 : f32
    %431 = vector.broadcast %cst_176 : f32 to vector<8x32xf32>
    %432 = arith.addf %431, %430 : vector<8x32xf32>
    %cst_177 = arith.constant 1.000000e+00 : f32
    %433 = vector.broadcast %cst_177 : f32 to vector<8x32xf32>
    %434 = arith.divf %433, %432 : vector<8x32xf32>
    %435 = vector.extract_strided_slice %426 {offsets = [0, 32], sizes = [8, 32], strides = [1, 1]} : vector<8x128xf32> to vector<8x32xf32>
    %cst_178 = arith.constant 0.000000e+00 : f32
    %436 = vector.broadcast %cst_178 : f32 to vector<8x32xf32>
    %437 = arith.subf %436, %435 : vector<8x32xf32>
    %438 = math.exp %437 : vector<8x32xf32>
    %cst_179 = arith.constant 1.000000e+00 : f32
    %439 = vector.broadcast %cst_179 : f32 to vector<8x32xf32>
    %440 = arith.addf %439, %438 : vector<8x32xf32>
    %cst_180 = arith.constant 1.000000e+00 : f32
    %441 = vector.broadcast %cst_180 : f32 to vector<8x32xf32>
    %442 = arith.divf %441, %440 : vector<8x32xf32>
    %443 = vector.extract_strided_slice %426 {offsets = [0, 64], sizes = [8, 32], strides = [1, 1]} : vector<8x128xf32> to vector<8x32xf32>
    %444 = math.tanh %443 : vector<8x32xf32>
    %445 = vector.extract_strided_slice %426 {offsets = [0, 96], sizes = [8, 32], strides = [1, 1]} : vector<8x128xf32> to vector<8x32xf32>
    %cst_181 = arith.constant 0.000000e+00 : f32
    %446 = vector.broadcast %cst_181 : f32 to vector<8x32xf32>
    %447 = arith.subf %446, %445 : vector<8x32xf32>
    %448 = math.exp %447 : vector<8x32xf32>
    %cst_182 = arith.constant 1.000000e+00 : f32
    %449 = vector.broadcast %cst_182 : f32 to vector<8x32xf32>
    %450 = arith.addf %449, %448 : vector<8x32xf32>
    %cst_183 = arith.constant 1.000000e+00 : f32
    %451 = vector.broadcast %cst_183 : f32 to vector<8x32xf32>
    %452 = arith.divf %451, %450 : vector<8x32xf32>
    %453 = arith.mulf %442, %381 : vector<8x32xf32>
    %454 = arith.mulf %434, %444 : vector<8x32xf32>
    %455 = arith.addf %453, %454 : vector<8x32xf32>
    %456 = math.tanh %455 : vector<8x32xf32>
    %457 = arith.mulf %452, %456 : vector<8x32xf32>
    %458 = vector.extract_strided_slice %13 {offsets = [48, 0], sizes = [8, 128], strides = [1, 1]} : vector<64x128xf32> to vector<8x128xf32>
    %c0_184 = arith.constant 0 : index
    %c0_185 = arith.constant 0 : index
    %459 = vector.load %arg4[%c0_184, %c0_185] : memref<32x128xf32, #tpu.memory_space<vmem>>, vector<32x128xf32>
    %cst_186 = arith.constant dense<0.000000e+00> : vector<8x128xf32>
    %460 = tpu.matmul %418, %459, %cst_186 {dimension_numbers = #tpu.dot_dimension_numbers<[1], [0], [0], [1], [0, 0, 1, 1], [], []>} : vector<8x32xf32>, vector<32x128xf32>, vector<8x128xf32> -> vector<8x128xf32>
    %461 = arith.addf %458, %460 : vector<8x128xf32>
    %462 = vector.extract_strided_slice %461 {offsets = [0, 0], sizes = [8, 32], strides = [1, 1]} : vector<8x128xf32> to vector<8x32xf32>
    %cst_187 = arith.constant 0.000000e+00 : f32
    %463 = vector.broadcast %cst_187 : f32 to vector<8x32xf32>
    %464 = arith.subf %463, %462 : vector<8x32xf32>
    %465 = math.exp %464 : vector<8x32xf32>
    %cst_188 = arith.constant 1.000000e+00 : f32
    %466 = vector.broadcast %cst_188 : f32 to vector<8x32xf32>
    %467 = arith.addf %466, %465 : vector<8x32xf32>
    %cst_189 = arith.constant 1.000000e+00 : f32
    %468 = vector.broadcast %cst_189 : f32 to vector<8x32xf32>
    %469 = arith.divf %468, %467 : vector<8x32xf32>
    %470 = vector.extract_strided_slice %461 {offsets = [0, 32], sizes = [8, 32], strides = [1, 1]} : vector<8x128xf32> to vector<8x32xf32>
    %cst_190 = arith.constant 0.000000e+00 : f32
    %471 = vector.broadcast %cst_190 : f32 to vector<8x32xf32>
    %472 = arith.subf %471, %470 : vector<8x32xf32>
    %473 = math.exp %472 : vector<8x32xf32>
    %cst_191 = arith.constant 1.000000e+00 : f32
    %474 = vector.broadcast %cst_191 : f32 to vector<8x32xf32>
    %475 = arith.addf %474, %473 : vector<8x32xf32>
    %cst_192 = arith.constant 1.000000e+00 : f32
    %476 = vector.broadcast %cst_192 : f32 to vector<8x32xf32>
    %477 = arith.divf %476, %475 : vector<8x32xf32>
    %478 = vector.extract_strided_slice %461 {offsets = [0, 64], sizes = [8, 32], strides = [1, 1]} : vector<8x128xf32> to vector<8x32xf32>
    %479 = math.tanh %478 : vector<8x32xf32>
    %480 = vector.extract_strided_slice %461 {offsets = [0, 96], sizes = [8, 32], strides = [1, 1]} : vector<8x128xf32> to vector<8x32xf32>
    %cst_193 = arith.constant 0.000000e+00 : f32
    %481 = vector.broadcast %cst_193 : f32 to vector<8x32xf32>
    %482 = arith.subf %481, %480 : vector<8x32xf32>
    %483 = math.exp %482 : vector<8x32xf32>
    %cst_194 = arith.constant 1.000000e+00 : f32
    %484 = vector.broadcast %cst_194 : f32 to vector<8x32xf32>
    %485 = arith.addf %484, %483 : vector<8x32xf32>
    %cst_195 = arith.constant 1.000000e+00 : f32
    %486 = vector.broadcast %cst_195 : f32 to vector<8x32xf32>
    %487 = arith.divf %486, %485 : vector<8x32xf32>
    %488 = arith.mulf %477, %416 : vector<8x32xf32>
    %489 = arith.mulf %469, %479 : vector<8x32xf32>
    %490 = arith.addf %488, %489 : vector<8x32xf32>
    %491 = math.tanh %490 : vector<8x32xf32>
    %492 = arith.mulf %487, %491 : vector<8x32xf32>
    %493 = tpu.concatenate %492, %457 in 1 : vector<8x32xf32>, vector<8x32xf32> -> vector<8x64xf32>
    %c0_196 = arith.constant 0 : index
    %c0_197 = arith.constant 0 : index
    %c0_198 = arith.constant 0 : index
    %494 = vector.load %arg6[%c0_196, %c0_197, %c0_198] : memref<1x64x128xf32, #tpu.memory_space<vmem>>, vector<1x64x128xf32>
    %495 = vector.shape_cast %494 : vector<1x64x128xf32> to vector<64x128xf32>
    %cst_199 = arith.constant dense<0.000000e+00> : vector<8x128xf32>
    %496 = tpu.matmul %493, %495, %cst_199 {dimension_numbers = #tpu.dot_dimension_numbers<[1], [0], [0], [1], [0, 0, 1, 1], [], []>} : vector<8x64xf32>, vector<64x128xf32>, vector<8x128xf32> -> vector<8x128xf32>
    %c0_200 = arith.constant 0 : index
    %c0_201 = arith.constant 0 : index
    %c0_202 = arith.constant 0 : index
    %497 = vector.load %arg7[%c0_200, %c0_201, %c0_202] : memref<1x1x128xf32, #tpu.memory_space<vmem>>, vector<1x1x128xf32>
    %498 = vector.shape_cast %497 : vector<1x1x128xf32> to vector<1x128xf32>
    %499 = vector.broadcast %498 : vector<1x128xf32> to vector<8x128xf32>
    %500 = arith.addf %496, %499 : vector<8x128xf32>
    %501 = vector.extract_strided_slice %500 {offsets = [0, 0], sizes = [8, 32], strides = [1, 1]} : vector<8x128xf32> to vector<8x32xf32>
    %cst_203 = arith.constant 0.000000e+00 : f32
    %502 = vector.broadcast %cst_203 : f32 to vector<8x32xf32>
    %503 = arith.subf %502, %501 : vector<8x32xf32>
    %504 = math.exp %503 : vector<8x32xf32>
    %cst_204 = arith.constant 1.000000e+00 : f32
    %505 = vector.broadcast %cst_204 : f32 to vector<8x32xf32>
    %506 = arith.addf %505, %504 : vector<8x32xf32>
    %cst_205 = arith.constant 1.000000e+00 : f32
    %507 = vector.broadcast %cst_205 : f32 to vector<8x32xf32>
    %508 = arith.divf %507, %506 : vector<8x32xf32>
    %509 = vector.extract_strided_slice %500 {offsets = [0, 32], sizes = [8, 32], strides = [1, 1]} : vector<8x128xf32> to vector<8x32xf32>
    %cst_206 = arith.constant 0.000000e+00 : f32
    %510 = vector.broadcast %cst_206 : f32 to vector<8x32xf32>
    %511 = arith.subf %510, %509 : vector<8x32xf32>
    %512 = math.exp %511 : vector<8x32xf32>
    %cst_207 = arith.constant 1.000000e+00 : f32
    %513 = vector.broadcast %cst_207 : f32 to vector<8x32xf32>
    %514 = arith.addf %513, %512 : vector<8x32xf32>
    %cst_208 = arith.constant 1.000000e+00 : f32
    %515 = vector.broadcast %cst_208 : f32 to vector<8x32xf32>
    %516 = arith.divf %515, %514 : vector<8x32xf32>
    %517 = vector.extract_strided_slice %500 {offsets = [0, 64], sizes = [8, 32], strides = [1, 1]} : vector<8x128xf32> to vector<8x32xf32>
    %518 = math.tanh %517 : vector<8x32xf32>
    %519 = vector.extract_strided_slice %500 {offsets = [0, 96], sizes = [8, 32], strides = [1, 1]} : vector<8x128xf32> to vector<8x32xf32>
    %cst_209 = arith.constant 0.000000e+00 : f32
    %520 = vector.broadcast %cst_209 : f32 to vector<8x32xf32>
    %521 = arith.subf %520, %519 : vector<8x32xf32>
    %522 = math.exp %521 : vector<8x32xf32>
    %cst_210 = arith.constant 1.000000e+00 : f32
    %523 = vector.broadcast %cst_210 : f32 to vector<8x32xf32>
    %524 = arith.addf %523, %522 : vector<8x32xf32>
    %cst_211 = arith.constant 1.000000e+00 : f32
    %525 = vector.broadcast %cst_211 : f32 to vector<8x32xf32>
    %526 = arith.divf %525, %524 : vector<8x32xf32>
    %527 = arith.mulf %516, %455 : vector<8x32xf32>
    %528 = arith.mulf %508, %518 : vector<8x32xf32>
    %529 = arith.addf %527, %528 : vector<8x32xf32>
    %530 = math.tanh %529 : vector<8x32xf32>
    %531 = arith.mulf %526, %530 : vector<8x32xf32>
    %532 = vector.extract_strided_slice %13 {offsets = [56, 0], sizes = [8, 128], strides = [1, 1]} : vector<64x128xf32> to vector<8x128xf32>
    %c0_212 = arith.constant 0 : index
    %c0_213 = arith.constant 0 : index
    %533 = vector.load %arg4[%c0_212, %c0_213] : memref<32x128xf32, #tpu.memory_space<vmem>>, vector<32x128xf32>
    %cst_214 = arith.constant dense<0.000000e+00> : vector<8x128xf32>
    %534 = tpu.matmul %492, %533, %cst_214 {dimension_numbers = #tpu.dot_dimension_numbers<[1], [0], [0], [1], [0, 0, 1, 1], [], []>} : vector<8x32xf32>, vector<32x128xf32>, vector<8x128xf32> -> vector<8x128xf32>
    %535 = arith.addf %532, %534 : vector<8x128xf32>
    %536 = vector.extract_strided_slice %535 {offsets = [0, 0], sizes = [8, 32], strides = [1, 1]} : vector<8x128xf32> to vector<8x32xf32>
    %cst_215 = arith.constant 0.000000e+00 : f32
    %537 = vector.broadcast %cst_215 : f32 to vector<8x32xf32>
    %538 = arith.subf %537, %536 : vector<8x32xf32>
    %539 = math.exp %538 : vector<8x32xf32>
    %cst_216 = arith.constant 1.000000e+00 : f32
    %540 = vector.broadcast %cst_216 : f32 to vector<8x32xf32>
    %541 = arith.addf %540, %539 : vector<8x32xf32>
    %cst_217 = arith.constant 1.000000e+00 : f32
    %542 = vector.broadcast %cst_217 : f32 to vector<8x32xf32>
    %543 = arith.divf %542, %541 : vector<8x32xf32>
    %544 = vector.extract_strided_slice %535 {offsets = [0, 32], sizes = [8, 32], strides = [1, 1]} : vector<8x128xf32> to vector<8x32xf32>
    %cst_218 = arith.constant 0.000000e+00 : f32
    %545 = vector.broadcast %cst_218 : f32 to vector<8x32xf32>
    %546 = arith.subf %545, %544 : vector<8x32xf32>
    %547 = math.exp %546 : vector<8x32xf32>
    %cst_219 = arith.constant 1.000000e+00 : f32
    %548 = vector.broadcast %cst_219 : f32 to vector<8x32xf32>
    %549 = arith.addf %548, %547 : vector<8x32xf32>
    %cst_220 = arith.constant 1.000000e+00 : f32
    %550 = vector.broadcast %cst_220 : f32 to vector<8x32xf32>
    %551 = arith.divf %550, %549 : vector<8x32xf32>
    %552 = vector.extract_strided_slice %535 {offsets = [0, 64], sizes = [8, 32], strides = [1, 1]} : vector<8x128xf32> to vector<8x32xf32>
    %553 = math.tanh %552 : vector<8x32xf32>
    %554 = vector.extract_strided_slice %535 {offsets = [0, 96], sizes = [8, 32], strides = [1, 1]} : vector<8x128xf32> to vector<8x32xf32>
    %cst_221 = arith.constant 0.000000e+00 : f32
    %555 = vector.broadcast %cst_221 : f32 to vector<8x32xf32>
    %556 = arith.subf %555, %554 : vector<8x32xf32>
    %557 = math.exp %556 : vector<8x32xf32>
    %cst_222 = arith.constant 1.000000e+00 : f32
    %558 = vector.broadcast %cst_222 : f32 to vector<8x32xf32>
    %559 = arith.addf %558, %557 : vector<8x32xf32>
    %cst_223 = arith.constant 1.000000e+00 : f32
    %560 = vector.broadcast %cst_223 : f32 to vector<8x32xf32>
    %561 = arith.divf %560, %559 : vector<8x32xf32>
    %562 = arith.mulf %551, %490 : vector<8x32xf32>
    %563 = arith.mulf %543, %553 : vector<8x32xf32>
    %564 = arith.addf %562, %563 : vector<8x32xf32>
    %565 = math.tanh %564 : vector<8x32xf32>
    %566 = arith.mulf %561, %565 : vector<8x32xf32>
    %567 = tpu.concatenate %566, %531 in 1 : vector<8x32xf32>, vector<8x32xf32> -> vector<8x64xf32>
    %c0_224 = arith.constant 0 : index
    %c0_225 = arith.constant 0 : index
    %c0_226 = arith.constant 0 : index
    %568 = vector.load %arg6[%c0_224, %c0_225, %c0_226] : memref<1x64x128xf32, #tpu.memory_space<vmem>>, vector<1x64x128xf32>
    %569 = vector.shape_cast %568 : vector<1x64x128xf32> to vector<64x128xf32>
    %cst_227 = arith.constant dense<0.000000e+00> : vector<8x128xf32>
    %570 = tpu.matmul %567, %569, %cst_227 {dimension_numbers = #tpu.dot_dimension_numbers<[1], [0], [0], [1], [0, 0, 1, 1], [], []>} : vector<8x64xf32>, vector<64x128xf32>, vector<8x128xf32> -> vector<8x128xf32>
    %c0_228 = arith.constant 0 : index
    %c0_229 = arith.constant 0 : index
    %c0_230 = arith.constant 0 : index
    %571 = vector.load %arg7[%c0_228, %c0_229, %c0_230] : memref<1x1x128xf32, #tpu.memory_space<vmem>>, vector<1x1x128xf32>
    %572 = vector.shape_cast %571 : vector<1x1x128xf32> to vector<1x128xf32>
    %573 = vector.broadcast %572 : vector<1x128xf32> to vector<8x128xf32>
    %574 = arith.addf %570, %573 : vector<8x128xf32>
    %575 = vector.extract_strided_slice %574 {offsets = [0, 0], sizes = [8, 32], strides = [1, 1]} : vector<8x128xf32> to vector<8x32xf32>
    %cst_231 = arith.constant 0.000000e+00 : f32
    %576 = vector.broadcast %cst_231 : f32 to vector<8x32xf32>
    %577 = arith.subf %576, %575 : vector<8x32xf32>
    %578 = math.exp %577 : vector<8x32xf32>
    %cst_232 = arith.constant 1.000000e+00 : f32
    %579 = vector.broadcast %cst_232 : f32 to vector<8x32xf32>
    %580 = arith.addf %579, %578 : vector<8x32xf32>
    %cst_233 = arith.constant 1.000000e+00 : f32
    %581 = vector.broadcast %cst_233 : f32 to vector<8x32xf32>
    %582 = arith.divf %581, %580 : vector<8x32xf32>
    %583 = vector.extract_strided_slice %574 {offsets = [0, 32], sizes = [8, 32], strides = [1, 1]} : vector<8x128xf32> to vector<8x32xf32>
    %cst_234 = arith.constant 0.000000e+00 : f32
    %584 = vector.broadcast %cst_234 : f32 to vector<8x32xf32>
    %585 = arith.subf %584, %583 : vector<8x32xf32>
    %586 = math.exp %585 : vector<8x32xf32>
    %cst_235 = arith.constant 1.000000e+00 : f32
    %587 = vector.broadcast %cst_235 : f32 to vector<8x32xf32>
    %588 = arith.addf %587, %586 : vector<8x32xf32>
    %cst_236 = arith.constant 1.000000e+00 : f32
    %589 = vector.broadcast %cst_236 : f32 to vector<8x32xf32>
    %590 = arith.divf %589, %588 : vector<8x32xf32>
    %591 = vector.extract_strided_slice %574 {offsets = [0, 64], sizes = [8, 32], strides = [1, 1]} : vector<8x128xf32> to vector<8x32xf32>
    %592 = math.tanh %591 : vector<8x32xf32>
    %593 = vector.extract_strided_slice %574 {offsets = [0, 96], sizes = [8, 32], strides = [1, 1]} : vector<8x128xf32> to vector<8x32xf32>
    %cst_237 = arith.constant 0.000000e+00 : f32
    %594 = vector.broadcast %cst_237 : f32 to vector<8x32xf32>
    %595 = arith.subf %594, %593 : vector<8x32xf32>
    %596 = math.exp %595 : vector<8x32xf32>
    %cst_238 = arith.constant 1.000000e+00 : f32
    %597 = vector.broadcast %cst_238 : f32 to vector<8x32xf32>
    %598 = arith.addf %597, %596 : vector<8x32xf32>
    %cst_239 = arith.constant 1.000000e+00 : f32
    %599 = vector.broadcast %cst_239 : f32 to vector<8x32xf32>
    %600 = arith.divf %599, %598 : vector<8x32xf32>
    %601 = arith.mulf %590, %529 : vector<8x32xf32>
    %602 = arith.mulf %582, %592 : vector<8x32xf32>
    %603 = arith.addf %601, %602 : vector<8x32xf32>
    %604 = math.tanh %603 : vector<8x32xf32>
    %605 = arith.mulf %600, %604 : vector<8x32xf32>
    %606 = tpu.concatenate %87, %161, %235, %309, %383, %457, %531, %605 in 0 : vector<8x32xf32>, vector<8x32xf32>, vector<8x32xf32>, vector<8x32xf32>, vector<8x32xf32>, vector<8x32xf32>, vector<8x32xf32>, vector<8x32xf32> -> vector<64x32xf32>
    %c0_240 = arith.constant 0 : index
    %c0_241 = arith.constant 0 : index
    %607 = vector.load %arg8[%c0_240, %c0_241] : memref<32x6xf32, #tpu.memory_space<vmem>>, vector<32x6xf32>
    %cst_242 = arith.constant dense<0.000000e+00> : vector<64x6xf32>
    %608 = tpu.matmul %606, %607, %cst_242 {dimension_numbers = #tpu.dot_dimension_numbers<[1], [0], [0], [1], [0, 0, 1, 1], [], []>} : vector<64x32xf32>, vector<32x6xf32>, vector<64x6xf32> -> vector<64x6xf32>
    %c0_243 = arith.constant 0 : index
    %c0_244 = arith.constant 0 : index
    %609 = vector.load %arg9[%c0_243, %c0_244] : memref<1x6xf32, #tpu.memory_space<vmem>>, vector<1x6xf32>
    %610 = vector.broadcast %609 : vector<1x6xf32> to vector<64x6xf32>
    %611 = arith.addf %608, %610 : vector<64x6xf32>
    %612 = vector.extract_strided_slice %611 {offsets = [0, 0], sizes = [64, 5], strides = [1, 1]} : vector<64x6xf32> to vector<64x5xf32>
    %cst_245 = arith.constant dense<0xFF800000> : vector<64xf32>
    %613 = vector.multi_reduction <maximumf>, %612, %cst_245 [1] : vector<64x5xf32> to vector<64xf32>
    %614 = vector.shape_cast %613 : vector<64xf32> to vector<64x1xf32>
    %615 = vector.broadcast %614 : vector<64x1xf32> to vector<64x5xf32>
    %616 = arith.subf %612, %615 : vector<64x5xf32>
    %617 = math.exp %616 : vector<64x5xf32>
    %cst_246 = arith.constant dense<0.000000e+00> : vector<64xf32>
    %618 = vector.multi_reduction <add>, %617, %cst_246 [1] : vector<64x5xf32> to vector<64xf32>
    %619 = vector.shape_cast %618 : vector<64xf32> to vector<64x1xf32>
    %620 = math.log %619 : vector<64x1xf32>
    %621 = arith.addf %620, %614 : vector<64x1xf32>
    %622 = vector.broadcast %621 : vector<64x1xf32> to vector<64x5xf32>
    %623 = arith.subf %612, %622 : vector<64x5xf32>
    %624 = vector.extract_strided_slice %611 {offsets = [0, 5], sizes = [64, 1], strides = [1, 1]} : vector<64x6xf32> to vector<64x1xf32>
    %cst_247 = arith.constant 0.000000e+00 : f32
    %625 = vector.broadcast %cst_247 : f32 to vector<64x1xf32>
    %626 = arith.minimumf %624, %625 : vector<64x1xf32>
    %627 = math.absf %624 : vector<64x1xf32>
    %cst_248 = arith.constant 0.000000e+00 : f32
    %628 = vector.broadcast %cst_248 : f32 to vector<64x1xf32>
    %629 = arith.subf %628, %627 : vector<64x1xf32>
    %630 = math.exp %629 : vector<64x1xf32>
    %cst_249 = arith.constant 1.000000e+00 : f32
    %631 = vector.broadcast %cst_249 : f32 to vector<64x1xf32>
    %632 = arith.addf %631, %630 : vector<64x1xf32>
    %633 = math.log %632 : vector<64x1xf32>
    %634 = arith.subf %626, %633 : vector<64x1xf32>
    %635 = tpu.concatenate %623, %634 in 1 : vector<64x5xf32>, vector<64x1xf32> -> vector<64x6xf32>
    %c0_250 = arith.constant 0 : index
    %c0_251 = arith.constant 0 : index
    %636 = vector.load %arg10[%c0_250, %c0_251] : memref<64x6xf32, #tpu.memory_space<vmem>>, vector<64x6xf32>
    tpu.vector_store %arg10[%c0_250, %c0_251], %635 {strides = array<i32>} : memref<64x6xf32, #tpu.memory_space<vmem>>, vector<64x6xf32>,
    return
  }
}

</mosaic_0001>

<bundles_post_ra>
// kernel: tpu_custom_call.1
= control target key start
LH: loop header
LB: loop body
LE: loop exit
PB: predicated region body
PF: predicated region fallthrough
CT: control target
= control target key end

     0   :  { %15 = vsyncpa [#allocation3], 0  ;;  %s3745_s0 = inlined_call_operand.vmem [shape: f32[64,32], index: 0, kind: input, shape index: {}]   ;;  %s3746_s1 = inlined_call_operand.hbm [shape: f32[2,8,32], index: 1, kind: input, shape index: {}]   ;;  %s3747_s2 = inlined_call_operand.hbm [shape: f32[2,8,32], index: 2, kind: input, shape index: {}]   ;;  %s3748_s3 = inlined_call_operand.vmem [shape: f32[32,128], index: 3, kind: input, shape index: {}]   ;;  %s3749_s4 = inlined_call_operand.vmem [shape: f32[32,128], index: 4, kind: input, shape index: {}]   ;;  %s3750_s5 = inlined_call_operand.vmem [shape: f32[1,128], index: 5, kind: input, shape index: {}]   ;;  %s3751_s6 = inlined_call_operand.vmem [shape: f32[1,64,128], index: 6, kind: input, shape index: {}]   ;;  %s3752_s7 = inlined_call_operand.vmem [shape: f32[1,1,128], index: 7, kind: input, shape index: {}]   ;;  %s3753_s8 = inlined_call_operand.vmem [shape: f32[32,6], index: 8, kind: input, shape index: {}]   ;;  %s3754_s9 = inlined_call_operand.vmem [shape: f32[1,6], index: 9, kind: input, shape index: {}]   ;;  %s3755_s10 = inlined_call_operand.vmem [shape: f32[64,6], index: 10, kind: output, shape index: {}]  }
   0x1   :  { %16 = vsyncpa [#allocation5], 0  ;;  %s2929_s13 = smov [#allocation2]  }
   0x2   :  { %s24_s14 = sshll.u32 %s2929_s13, 4  ;;  %s25_s14 = int_to_ptr.vmem [resolvable:$true] %s24_s14 }
   0x3   :  { %s2893_s15 = scalar_lea.vmem %s25_s14, 256  ;;  %p2898_p1 = scmp.lt.s32.totalorder %s25_s14, %s25_s14 }
   0x4   :  { %p2894_p0 = scmp.ne.s32.totalorder %s25_s14, %s2893_s15  ;;  %p2899_p2 = scmp.lt.s32.totalorder %s2893_s15, %s2893_s15 }
   0x6   :  { %p2900_p3 = por %p2899_p2, %p2898_p1 }
   0x8   :  { %p2901_p4 = pnand %p2900_p3, %p2894_p0 }
   0xa   :  { %2904 = shalt.err (!%p2901_p4)
}
   0xb   :  { %s2930_s16 = smov 128   ;;  %s2931_s17 = smov 8  }
   0xc   :  { %30 = dma.hbm_to_vmem [thread:$0]  %s3746_s1, 256, %s25_s14, [#allocation3], %s2930_s16, %s2930_s16, %s2931_s17  }
   0xd   :  { %s2932_s20 = smov [#allocation4]  }
   0xe   :  { %s36_s21 = sshll.u32 %s2932_s20, 4  ;;  %s37_s21 = int_to_ptr.vmem [resolvable:$true] %s36_s21 }
   0xf   :  { %s2913_s22 = scalar_lea.vmem %s37_s21, 256  ;;  %p2918_p6 = scmp.lt.s32.totalorder %s37_s21, %s37_s21 }
  0x10   :  { %p2914_p5 = scmp.ne.s32.totalorder %s37_s21, %s2913_s22  ;;  %p2919_p7 = scmp.lt.s32.totalorder %s2913_s22, %s2913_s22 }
  0x12   :  { %p2920_p8 = por %p2919_p7, %p2918_p6 }
  0x14   :  { %p2921_p9 = pnand %p2920_p8, %p2914_p5 }
  0x16   :  { %2924 = shalt.err (!%p2921_p9)
}
  0x17   :  { %42 = dma.hbm_to_vmem [thread:$0]  %s3747_s2, 256, %s37_s21, [#allocation5], %s2930_s16, %s2930_s16, %s2931_s17  }
  0x18   :  { %2925 = dma.done.wait [#allocation3], 256  }
  0x19   :  { %2926 = vsyncadd [#allocation3], 4294967040 }
  0x1a   :  { %2927 = dma.done.wait [#allocation5], 256  }
  0x1b   :  { %2928 = vsyncadd [#allocation5], 4294967040  ;;  %v2933_v0 = vmov 0.0   ;;  %vm2934_vm0 = vmmov 0   ;;  %v80_v1 = vld [vmem:[%s3748_s3 + $0x18] sm:$0xff]  ;;  %v79_v2 = vld [vmem:[%s3748_s3 + $0x10] sm:$0xff] }
  0x1c   :  { %2411 = vmatprep.subr.mxu1 %v2933_v0  ;;  %2419 = vmatprep.mubr.msk.f32.mxu1 %vm2934_vm0, %v2933_v0  ;;  %v3010_v3 = vld [vmem:[%s3749_s4 + $0x18] sm:$0xff]  ;;  %v3016_v4 = vld [vmem:[%s3749_s4 + $0x10] sm:$0xff]  ;;  %v78_v5 = vld [vmem:[%s3748_s3 + $0x8] sm:$0xff]  ;;  %vm88_vm1 = vcmask 261120   ;;  %s2935_s24 = smov 64   ;;  %s2936_s1 = smov 32  }
  0x1d   :  { %2391 = vmatprep.subr.mxu0 %v80_v1  ;;  %2412 = vmatpush3.msra.mxu1 %v3010_v3  ;;  %v69_v6 = vld [vmem:[%s3745_s0] sm:$0xff]  ;;  %v3029_v7 = vld [vmem:[%s3749_s4 + $0x8] sm:$0xff]  ;;  %v66_v20 = vld [vmem:[#allocation4] sm:$0xff]  ;;  %vm348_vm2 = vcmask 523264   ;;  %vm2020_vm3 = vcmask 39936   ;;  %vm2205_vm4 = vcmask 48128  }
  0x1e   :  { %2392 = vmatpush3.msra.mxu0 %v80_v1  ;;  %2413 = vmatprep.subr.mxu1 %v2933_v0  ;;  %v77_v8 = vld [vmem:[%s3748_s3] sm:$0xff]  ;;  %v70_v10 = vld [vmem:[%s3745_s0 + $0x8] sm:$0xff]  ;;  %v3078_v32 = vld [vmem:[%s3751_s6 + $0x38] sm:$0xff] }
  0x1f   :  { %2393 = vmatprep.subr.mxu0 %v79_v2  ;;  %2414 = vmatpush3.msra.mxu1 %v3016_v4  ;;  %v3039_v9 = vld [vmem:[%s3749_s4] sm:$0xff]  ;;  %v71_v33 = vld [vmem:[%s3745_s0 + $0x10] sm:$0xff]  ;;  %v72_v34 = vld [vmem:[%s3745_s0 + $0x18] sm:$0xff] }
  0x20   :  { %2394 = vmatpush3.msra.mxu0 %v79_v2  ;;  %2415 = vmatprep.subr.mxu1 %v2933_v0  ;;  %v63_v11 = vld [vmem:[#allocation2] sm:$0xff]  ;;  %v3091_v35 = vld [vmem:[%s3751_s6 + $0x30] sm:$0xff]  ;;  %v3101_v37 = vld [vmem:[%s3751_s6 + $0x28] sm:$0xff] }
  0x21   :  { %2395 = vmatprep.subr.mxu0 %v78_v5  ;;  %2399 = vmatprep.mubr.msk.f32.mxu0 %vm88_vm1, %v69_v6  ;;  %v3066_v14 = vld [vmem:[%s3750_s5] ss:$0 sm:$0xff]  ;;  %v74_v38 = vld [vmem:[%s3745_s0 + $0x28] sm:$0xff]  ;;  %v75_v40 = vld [vmem:[%s3745_s0 + $0x30] sm:$0xff] }
  0x22   :  { %2396 = vmatpush3.msra.mxu0 %v78_v5  ;;  %2416 = vmatpush3.msra.mxu1 %v3029_v7  ;;  %v73_v36 = vld [vmem:[%s3745_s0 + $0x20] sm:$0xff]  ;;  %v3123_v41 = vld [vmem:[%s3751_s6 + $0x18] sm:$0xff]  ;;  %v3134_v43 = vld [vmem:[%s3751_s6 + $0x10] sm:$0xff] }
  0x23   :  { %2397 = vmatprep.subr.mxu0 %v77_v8  ;;  %2417 = vmatprep.subr.mxu1 %v2933_v0  ;;  %v3112_v39 = vld [vmem:[%s3751_s6 + $0x20] sm:$0xff]  ;;  %v76_v42 = vld [vmem:[%s3745_s0 + $0x38] sm:$0xff]  ;;  %v3142_v45 = vld [vmem:[%s3751_s6 + $0x8] sm:$0xff] }
  0x24   :  { %2398 = vmatpush3.msra.mxu0 %v77_v8  ;;  %2418 = vmatpush3.msra.mxu1 %v3039_v9  ;;  %v65_v46 = vld [vmem:[#allocation2 + $0x8] sm:$0xff]  ;;  %v3150_v47 = vld [vmem:[%s3751_s6] sm:$0xff] }
  0x25   :  { %2400 = vmatmul.mubr.msk.f32.vlgmr.msra.gmra.mxu0 %vm88_vm1, %v70_v10  ;;  %2420 = vmatmul.mubr.msk.f32.vlgmr.msra.gmra.mxu1 %vm88_vm1, %v63_v11  ;;  %v3216_v60 = vld [vmem:[%s3752_s7] ss:$0 sm:$0xff]  ;;  %v68_v10 = vld [vmem:[#allocation4 + $0x8] sm:$0xff] }
  0x26   :  { %2422 = vmatprep.subr.mxu0 %v2933_v0  ;;  %2441 = vmatprep.subr.mxu1 %v2933_v0 }
  0x27   :  { %2442 = vmatpush3.msra.mxu1 %v3010_v3  ;;  %2449 = vmatprep.mubr.msk.f32.mxu1 %vm2934_vm0, %v2933_v0 }
  0x28   :  { %2443 = vmatprep.subr.mxu1 %v2933_v0  ;;  %2423 = vmatpush3.msra.mxu0 %v3078_v32 }
  0x29   :  { %2444 = vmatpush3.msra.mxu1 %v3016_v4  ;;  %2402 = vmatprep.mubr.msk.f32.mxu0 %vm88_vm1, %v71_v33 }
  0x2a   :  { %2445 = vmatprep.subr.mxu1 %v2933_v0  ;;  %2424 = vmatprep.subr.mxu0 %v2933_v0 }
  0x2b   :  { %2446 = vmatpush3.msra.mxu1 %v3029_v7  ;;  %2403 = vmatmul.mubr.msk.f32.gmra.mxu0 %vm88_vm1, %v72_v34 }
  0x2c   :  { %2447 = vmatprep.subr.mxu1 %v2933_v0  ;;  %2425 = vmatpush3.msra.mxu0 %v3091_v35 }
  0x2d   :  { %2448 = vmatpush3.msra.mxu1 %v3039_v9  ;;  %2405 = vmatprep.mubr.msk.f32.mxu0 %vm88_vm1, %v73_v36 }
  0x2e   :  { %2452 = vmatprep.subr.mxu1 %v2933_v0  ;;  %2426 = vmatprep.subr.mxu0 %v2933_v0 }
  0x2f   :  { %2427 = vmatpush3.msra.mxu0 %v3101_v37 }
  0x30   :  { %2428 = vmatprep.subr.mxu0 %v2933_v0  ;;  %2406 = vmatmul.mubr.msk.f32.gmra.mxu0 %vm88_vm1, %v74_v38 }
  0x31   :  { %2429 = vmatpush3.msra.mxu0 %v3112_v39  ;;  %2408 = vmatprep.mubr.msk.f32.mxu0 %vm88_vm1, %v75_v40 }
  0x32   :  { %2430 = vmatprep.subr.mxu0 %v2933_v0 }
  0x33   :  { %2431 = vmatpush3.msra.mxu0 %v3123_v41 }
  0x34   :  { %2432 = vmatprep.subr.mxu0 %v2933_v0  ;;  %2409 = vmatmul.mubr.msk.f32.gmra.mxu0 %vm88_vm1, %v76_v42 }
  0x35   :  { %2433 = vmatpush3.msra.mxu0 %v3134_v43  ;;  %2438 = vmatprep.mubr.msk.f32.mxu0 %vm2934_vm0, %v2933_v0 }
  0x36   :  { %2434 = vmatprep.subr.mxu0 %v2933_v0 }
  0x37   :  { %2435 = vmatpush3.msra.mxu0 %v3142_v45 }
  0x38   :  { %2436 = vmatprep.subr.mxu0 %v2933_v0 }
  0x39   :  { %2437 = vmatpush3.msra.mxu0 %v3150_v47 }
  0x3a   :  { %2482 = vmatprep.subr.mxu0 %v2933_v0 }
  0xe5   :  { %v3061_v12 = vpop.f32.mrf.mxu0  ;;  %v291_v13 = vpop.f32.mrf.mxu1 }
  0xe6   :  { %v185_v58 = vadd.f32 %v3061_v12, %v3066_v14 }
  0xe7   :  { %v179_v15 = vpop.f32.mrf.mxu0  ;;  %v2421_v16 = vpop.f32.mrf.mxu1 }
  0xe8   :  { %v180_v17 = vadd.f32 %v3066_v14, %v179_v15 }
  0xea   :  { %v295_v18 = vadd.f32 %v291_v13, %v180_v17 }
  0xeb   :  { %v3199_v53 = vpop.f32.mrf.mxu0 }
  0xec   :  { %2679 = vtanh.f32 %v295_v18  ;;  %v296_v21 = vsub.f32 0.0, %v295_v18 }
  0xed   :  { %v3201_v54 = vpop.f32.mrf.mxu0 }
  0xee   :  { %v297_v22 = vmul.f32 1.442695, %v296_v21 }
  0xf0   :  { %2681 = vpow2.f32 %v297_v22  ;;  %v3203_v55 = vpop.f32.mrf.mxu0 }
  0xf2   :  { %v3205_v56 = vpop.f32.mrf.mxu0 }
  0xf4   :  { %v3207_v57 = vpop.f32.mrf.mxu0 }
  0xf6   :  { %v3211_v59 = vpop.f32.mrf.mxu0 }
  0xf9   :  { %v2680_v19 = vpop.eup %2679 }
  0xfa   :  { %309 = vrot.lane.b32.xlu0 %v2680_v19, %s2935_s24 }
  0xfd   :  { %v2682_v23 = vpop.eup %2681 }
  0xfe   :  { %304 = vrot.lane.b32.xlu0 %v66_v20, %s2936_s1  ;;  %v299_v24 = vadd.f32 1.0, %v2682_v23 }
 0x100   :  { %2683 = vrcp.f32 %v299_v24 }
 0x10d   :  { %v2684_v25 = vpop.eup %2683 }
 0x16c   :  { %v310_v26 = vpop.permute.xlu0 %309 }
 0x16d   :  { %v312_v27 = vmul.f32 %v2684_v25, %v310_v26 }
 0x16f   :  { %314 = vrot.lane.b32.xlu1 %v312_v27, %s2936_s1 }
 0x170   :  { %v305_v28 = vpop.permute.xlu0 %304 }
 0x171   :  { %v307_v29 = vmul.f32 %v2684_v25, %v305_v28 }
 0x1e1   :  { %v315_v30 = vpop.permute.xlu1 %314 }
 0x1e2   :  { %v3072_v31 = vadd.f32 %v315_v30, %v307_v29 }
 0x1e4   :  { %2685 = vtanh.f32 %v3072_v31 }
 0x1f1   :  { %v2686_v44 = vpop.eup %2685 }
 0x1f2   :  { %320 = vrot.lane.b32.xlu1 %v2686_v44, %s2935_s24 }
 0x1f6   :  { %329 = vrot.lane.b32.xlu1 %v65_v46, %s2936_s1 }
 0x264   :  { %v321_v48 = vpop.permute.xlu1 %320 }
 0x265   :  { %v323_v49 = vmul.f32 %v2684_v25, %v321_v48 }
 0x267   :  { %325 = vrot.lane.b32.xlu0 %v323_v49, %s2936_s1 }
 0x268   :  { %v330_v50 = vpop.permute.xlu1 %329 }
 0x2d9   :  { %v326_v51 = vpop.permute.xlu0 %325 }
 0x2da   :  { %v332_v52 = vsel %vm88_vm1, %v326_v51, %v330_v50  ;;  %2450 = vmatmul.mubr.msk.f32.vlgmr.msra.gmra.mxu1 %vm88_vm1, %v326_v51 }
 0x2db   :  { %2439 = vmatmul.mubr.msk.f32.vlgmr.msra.gmra.mxu0 %vm348_vm2, %v332_v52  ;;  %2453 = vmatpush3.msra.mxu1 %v3078_v32 }
 0x2dc   :  { %2454 = vmatprep.subr.mxu1 %v2933_v0  ;;  %2468 = vmatprep.mubr.msk.f32.mxu1 %vm2934_vm0, %v2933_v0 }
 0x2dd   :  { %2455 = vmatpush3.msra.mxu1 %v3091_v35  ;;  %2483 = vmatpush3.msra.mxu0 %v3078_v32 }
 0x2de   :  { %2456 = vmatprep.subr.mxu1 %v2933_v0  ;;  %2484 = vmatprep.subr.mxu0 %v2933_v0 }
 0x2df   :  { %2457 = vmatpush3.msra.mxu1 %v3101_v37  ;;  %2485 = vmatpush3.msra.mxu0 %v3091_v35 }
 0x2e0   :  { %2458 = vmatprep.subr.mxu1 %v2933_v0  ;;  %2486 = vmatprep.subr.mxu0 %v2933_v0 }
 0x2e1   :  { %2459 = vmatpush3.msra.mxu1 %v3112_v39  ;;  %2487 = vmatpush3.msra.mxu0 %v3101_v37 }
 0x2e2   :  { %2460 = vmatprep.subr.mxu1 %v2933_v0  ;;  %2488 = vmatprep.subr.mxu0 %v2933_v0 }
 0x2e3   :  { %2461 = vmatpush3.msra.mxu1 %v3123_v41  ;;  %2489 = vmatpush3.msra.mxu0 %v3112_v39 }
 0x2e4   :  { %2462 = vmatprep.subr.mxu1 %v2933_v0  ;;  %2490 = vmatprep.subr.mxu0 %v2933_v0 }
 0x2e5   :  { %2463 = vmatpush3.msra.mxu1 %v3134_v43  ;;  %2491 = vmatpush3.msra.mxu0 %v3123_v41 }
 0x2e6   :  { %2464 = vmatprep.subr.mxu1 %v2933_v0  ;;  %2492 = vmatprep.subr.mxu0 %v2933_v0 }
 0x2e7   :  { %2465 = vmatpush3.msra.mxu1 %v3142_v45  ;;  %2493 = vmatpush3.msra.mxu0 %v3134_v43 }
 0x2e8   :  { %2466 = vmatprep.subr.mxu1 %v2933_v0  ;;  %2494 = vmatprep.subr.mxu0 %v2933_v0 }
 0x2e9   :  { %2467 = vmatpush3.msra.mxu1 %v3150_v47  ;;  %2495 = vmatpush3.msra.mxu0 %v3142_v45 }
 0x2ea   :  { %2471 = vmatprep.subr.mxu1 %v2933_v0  ;;  %2496 = vmatprep.subr.mxu0 %v2933_v0 }
 0x2eb   :  { %2497 = vmatpush3.msra.mxu0 %v3150_v47  ;;  %2498 = vmatprep.mubr.msk.f32.mxu0 %vm2934_vm0, %v2933_v0 }
 0x2ec   :  { %2531 = vmatprep.subr.mxu0 %v2933_v0 }
 0x39a   :  { %v518_v61 = vpop.f32.mrf.mxu1 }
 0x39b   :  { %v522_v62 = vadd.f32 %v518_v61, %v185_v58  ;;  %v418_v63 = vpop.f32.mrf.mxu0  ;;  %v190_v58 = vadd.f32 %v3066_v14, %v3201_v54 }
 0x39c   :  { %v419_v1 = vadd.f32 %v3216_v60, %v418_v63  ;;  %v2451_v2 = vpop.f32.mrf.mxu1 }
 0x39d   :  { %2687 = vtanh.f32 %v522_v62  ;;  %v2440_v5 = vpop.f32.mrf.mxu0  ;;  %v523_v11 = vsub.f32 0.0, %v522_v62 }
 0x39e   :  { %2689 = vtanh.f32 %v419_v1  ;;  %v422_v12 = vsub.f32 0.0, %v419_v1 }
 0x39f   :  { %v524_v13 = vmul.f32 1.442695, %v523_v11 }
 0x3a0   :  { %v423_v15 = vmul.f32 1.442695, %v422_v12 }
 0x3a1   :  { %2691 = vpow2.f32 %v524_v13 }
 0x3a2   :  { %2693 = vpow2.f32 %v423_v15 }
 0x3aa   :  { %v2688_v6 = vpop.eup %2687 }
 0x3ab   :  { %v2690_v8 = vpop.eup %2689  ;;  %532 = vrot.lane.b32.xlu1 %v2688_v6, %s2935_s24 }
 0x3ac   :  { %435 = vrot.lane.b32.xlu0 %v2690_v8, %s2935_s24 }
 0x3ae   :  { %v2692_v16 = vpop.eup %2691 }
 0x3af   :  { %v2694_v17 = vpop.eup %2693  ;;  %v526_v18 = vadd.f32 1.0, %v2692_v16 }
 0x3b0   :  { %430 = vrot.lane.b32.xlu0 %v68_v10, %s2936_s1  ;;  %v425_v19 = vadd.f32 1.0, %v2694_v17 }
 0x3b1   :  { %2695 = vrcp.f32 %v526_v18 }
 0x3b2   :  { %2697 = vrcp.f32 %v425_v19 }
 0x3be   :  { %v2696_v20 = vpop.eup %2695 }
 0x3bf   :  { %v2698_v22 = vpop.eup %2697  ;;  %v530_v27 = vmul.f32 %v2696_v20, %v3072_v31 }
 0x41d   :  { %v533_v21 = vpop.permute.xlu1 %532 }
 0x41e   :  { %v535_v23 = vmul.f32 %v2696_v20, %v533_v21  ;;  %v436_v24 = vpop.permute.xlu0 %435 }
 0x41f   :  { %v438_v25 = vmul.f32 %v2698_v22, %v436_v24 }
 0x420   :  { %537 = vrot.lane.b32.xlu0 %v535_v23, %s2936_s1 }
 0x421   :  { %440 = vrot.lane.b32.xlu1 %v438_v25, %s2936_s1 }
 0x422   :  { %v431_v26 = vpop.permute.xlu0 %430 }
 0x423   :  { %v433_v28 = vmul.f32 %v2698_v22, %v431_v26 }
 0x492   :  { %v538_v29 = vpop.permute.xlu0 %537 }
 0x493   :  { %v3225_v30 = vadd.f32 %v538_v29, %v530_v27  ;;  %v441_v33 = vpop.permute.xlu1 %440 }
 0x494   :  { %v3227_v34 = vadd.f32 %v441_v33, %v433_v28 }
 0x495   :  { %2699 = vtanh.f32 %v3225_v30 }
 0x496   :  { %2701 = vtanh.f32 %v3227_v34 }
 0x4a2   :  { %v2700_v36 = vpop.eup %2699 }
 0x4a3   :  { %v2702_v38 = vpop.eup %2701  ;;  %543 = vrot.lane.b32.xlu0 %v2700_v36, %s2935_s24 }
 0x4a4   :  { %446 = vrot.lane.b32.xlu1 %v2702_v38, %s2935_s24 }
 0x515   :  { %v544_v40 = vpop.permute.xlu0 %543 }
 0x516   :  { %v546_v42 = vmul.f32 %v2696_v20, %v544_v40  ;;  %v447_v31 = vpop.permute.xlu1 %446 }
 0x517   :  { %v3233_v44 = vmul.f32 %v2698_v22, %v447_v31 }
 0x518   :  { %548 = vrot.lane.b32.xlu1 %v546_v42, %s2936_s1  ;;  %v195_v42 = vadd.f32 %v3199_v53, %v3066_v14 }
 0x519   :  { %552 = vrot.lane.b32.xlu0 %v3233_v44, %s2935_s24 }
 0x58a   :  { %v549_v46 = vpop.permute.xlu1 %548 }
 0x58b   :  { %v553_v48 = vpop.permute.xlu0 %552 }
 0x58c   :  { %v555_v49 = vsel %vm88_vm1, %v549_v46, %v553_v48 }
 0x58d   :  { %2469 = vmatmul.mubr.msk.f32.vlgmr.msra.gmra.mxu1 %vm348_vm2, %v555_v49 }
 0x58e   :  { %2472 = vmatpush3.msra.mxu1 %v3010_v3  ;;  %2479 = vmatprep.mubr.msk.f32.mxu1 %vm2934_vm0, %v2933_v0 }
 0x58f   :  { %2473 = vmatprep.subr.mxu1 %v2933_v0 }
 0x590   :  { %2474 = vmatpush3.msra.mxu1 %v3016_v4 }
 0x591   :  { %2475 = vmatprep.subr.mxu1 %v2933_v0 }
 0x592   :  { %2476 = vmatpush3.msra.mxu1 %v3029_v7 }
 0x593   :  { %2477 = vmatprep.subr.mxu1 %v2933_v0 }
 0x594   :  { %2478 = vmatpush3.msra.mxu1 %v3039_v9 }
 0x595   :  { %2480 = vmatmul.mubr.msk.f32.vlgmr.msra.gmra.mxu1 %vm88_vm1, %v549_v46  ;;  %2501 = vmatprep.subr.mxu1 %v2933_v0 }
 0x596   :  { %2502 = vmatpush3.msra.mxu1 %v3010_v3  ;;  %2509 = vmatprep.mubr.msk.f32.mxu1 %vm2934_vm0, %v2933_v0 }
 0x597   :  { %2503 = vmatprep.subr.mxu1 %v2933_v0 }
 0x598   :  { %2504 = vmatpush3.msra.mxu1 %v3016_v4 }
 0x599   :  { %2505 = vmatprep.subr.mxu1 %v2933_v0 }
 0x59a   :  { %2506 = vmatpush3.msra.mxu1 %v3029_v7 }
 0x59b   :  { %2507 = vmatprep.subr.mxu1 %v2933_v0 }
 0x59c   :  { %2508 = vmatpush3.msra.mxu1 %v3039_v9 }
 0x59d   :  { %2512 = vmatprep.subr.mxu1 %v2933_v0 }
 0x64d   :  { %v625_v50 = vpop.f32.mrf.mxu1 }
 0x64e   :  { %v626_v51 = vadd.f32 %v3216_v60, %v625_v50 }
 0x64f   :  { %v2470_v52 = vpop.f32.mrf.mxu1 }
 0x650   :  { %2703 = vtanh.f32 %v626_v51  ;;  %v629_v5 = vsub.f32 0.0, %v626_v51 }
 0x652   :  { %v630_v6 = vmul.f32 1.442695, %v629_v5 }
 0x655   :  { %v721_v61 = vpop.f32.mrf.mxu1 }
 0x656   :  { %v725_v62 = vadd.f32 %v721_v61, %v190_v58 }
 0x657   :  { %v2481_v63 = vpop.f32.mrf.mxu1 }
 0x658   :  { %2705 = vtanh.f32 %v725_v62  ;;  %v726_v8 = vsub.f32 0.0, %v725_v62 }
 0x659   :  { %2707 = vpow2.f32 %v630_v6 }
 0x65a   :  { %v727_v10 = vmul.f32 1.442695, %v726_v8 }
 0x65c   :  { %2709 = vpow2.f32 %v727_v10 }
 0x65d   :  { %v2704_v1 = vpop.eup %2703 }
 0x65e   :  { %638 = vrot.lane.b32.xlu1 %v2704_v1, %s2935_s24 }
 0x665   :  { %v2706_v2 = vpop.eup %2705 }
 0x666   :  { %735 = vrot.lane.b32.xlu0 %v2706_v2, %s2935_s24  ;;  %v2708_v11 = vpop.eup %2707 }
 0x667   :  { %v632_v12 = vadd.f32 1.0, %v2708_v11 }
 0x669   :  { %2711 = vrcp.f32 %v632_v12  ;;  %v2710_v54 = vpop.eup %2709 }
 0x66a   :  { %v729_v13 = vadd.f32 1.0, %v2710_v54 }
 0x66c   :  { %2713 = vrcp.f32 %v729_v13 }
 0x676   :  { %v2712_v15 = vpop.eup %2711 }
 0x677   :  { %v636_v21 = vmul.f32 %v2712_v15, %v3227_v34 }
 0x679   :  { %v2714_v18 = vpop.eup %2713 }
 0x67a   :  { %v733_v24 = vmul.f32 %v2714_v18, %v3225_v30 }
 0x6d0   :  { %v639_v16 = vpop.permute.xlu1 %638 }
 0x6d1   :  { %v641_v17 = vmul.f32 %v2712_v15, %v639_v16 }
 0x6d3   :  { %643 = vrot.lane.b32.xlu1 %v641_v17, %s2936_s1 }
 0x6d8   :  { %v736_v19 = vpop.permute.xlu0 %735 }
 0x6d9   :  { %v738_v20 = vmul.f32 %v2714_v18, %v736_v19 }
 0x6db   :  { %740 = vrot.lane.b32.xlu0 %v738_v20, %s2936_s1 }
 0x745   :  { %v644_v22 = vpop.permute.xlu1 %643 }
 0x746   :  { %v3269_v23 = vadd.f32 %v644_v22, %v636_v21 }
 0x748   :  { %2715 = vtanh.f32 %v3269_v23 }
 0x74d   :  { %v741_v25 = vpop.permute.xlu0 %740 }
 0x74e   :  { %v3273_v26 = vadd.f32 %v741_v25, %v733_v24 }
 0x750   :  { %2717 = vtanh.f32 %v3273_v26 }
 0x755   :  { %v2716_v27 = vpop.eup %2715 }
 0x756   :  { %649 = vrot.lane.b32.xlu1 %v2716_v27, %s2935_s24 }
 0x75d   :  { %v2718_v28 = vpop.eup %2717 }
 0x75e   :  { %746 = vrot.lane.b32.xlu0 %v2718_v28, %s2935_s24 }
 0x7c8   :  { %v650_v29 = vpop.permute.xlu1 %649 }
 0x7c9   :  { %v3278_v33 = vmul.f32 %v2712_v15, %v650_v29 }
 0x7cb   :  { %755 = vrot.lane.b32.xlu0 %v3278_v33, %s2935_s24 }
 0x7d0   :  { %v747_v34 = vpop.permute.xlu0 %746 }
 0x7d1   :  { %v749_v36 = vmul.f32 %v2714_v18, %v747_v34  ;;  %v200_v34 = vadd.f32 %v3066_v14, %v3205_v56 }
 0x7d3   :  { %751 = vrot.lane.b32.xlu1 %v749_v36, %s2936_s1 }
 0x83d   :  { %v756_v30 = vpop.permute.xlu0 %755 }
 0x845   :  { %v752_v38 = vpop.permute.xlu1 %751 }
 0x846   :  { %v758_v40 = vsel %vm88_vm1, %v752_v38, %v756_v30  ;;  %2510 = vmatmul.mubr.msk.f32.vlgmr.msra.gmra.mxu1 %vm88_vm1, %v752_v38 }
 0x847   :  { %2499 = vmatmul.mubr.msk.f32.vlgmr.msra.gmra.mxu0 %vm348_vm2, %v758_v40  ;;  %2513 = vmatpush3.msra.mxu1 %v3078_v32 }
 0x848   :  { %2514 = vmatprep.subr.mxu1 %v2933_v0  ;;  %2532 = vmatpush3.msra.mxu0 %v3010_v3 }
 0x849   :  { %2515 = vmatpush3.msra.mxu1 %v3091_v35  ;;  %2533 = vmatprep.subr.mxu0 %v2933_v0 }
 0x84a   :  { %2516 = vmatprep.subr.mxu1 %v2933_v0  ;;  %2534 = vmatpush3.msra.mxu0 %v3016_v4 }
 0x84b   :  { %2517 = vmatpush3.msra.mxu1 %v3101_v37  ;;  %2535 = vmatprep.subr.mxu0 %v2933_v0 }
 0x84c   :  { %2518 = vmatprep.subr.mxu1 %v2933_v0  ;;  %2536 = vmatpush3.msra.mxu0 %v3029_v7 }
 0x84d   :  { %2519 = vmatpush3.msra.mxu1 %v3112_v39  ;;  %2537 = vmatprep.subr.mxu0 %v2933_v0 }
 0x84e   :  { %2520 = vmatprep.subr.mxu1 %v2933_v0  ;;  %2538 = vmatpush3.msra.mxu0 %v3039_v9 }
 0x84f   :  { %2521 = vmatpush3.msra.mxu1 %v3123_v41  ;;  %2539 = vmatprep.mubr.msk.f32.mxu0 %vm2934_vm0, %v2933_v0 }
 0x850   :  { %2522 = vmatprep.subr.mxu1 %v2933_v0  ;;  %2528 = vmatprep.mubr.msk.f32.mxu1 %vm2934_vm0, %v2933_v0 }
 0x851   :  { %2523 = vmatpush3.msra.mxu1 %v3134_v43  ;;  %2542 = vmatprep.subr.mxu0 %v2933_v0 }
 0x852   :  { %2524 = vmatprep.subr.mxu1 %v2933_v0 }
 0x853   :  { %2525 = vmatpush3.msra.mxu1 %v3142_v45 }
 0x854   :  { %2526 = vmatprep.subr.mxu1 %v2933_v0 }
 0x855   :  { %2527 = vmatpush3.msra.mxu1 %v3150_v47 }
 0x856   :  { %2561 = vmatprep.subr.mxu1 %v2933_v0 }
 0x906   :  { %v924_v31 = vpop.f32.mrf.mxu1 }
 0x907   :  { %v928_v46 = vadd.f32 %v924_v31, %v195_v42  ;;  %v828_v48 = vpop.f32.mrf.mxu0 }
 0x908   :  { %v829_v49 = vadd.f32 %v3216_v60, %v828_v48  ;;  %v2511_v50 = vpop.f32.mrf.mxu1 }
 0x909   :  { %2719 = vtanh.f32 %v928_v46  ;;  %v2500_v51 = vpop.f32.mrf.mxu0  ;;  %v929_v61 = vsub.f32 0.0, %v928_v46 }
 0x90a   :  { %2721 = vtanh.f32 %v829_v49  ;;  %v832_v62 = vsub.f32 0.0, %v829_v49 }
 0x90b   :  { %v930_v63 = vmul.f32 1.442695, %v929_v61 }
 0x90c   :  { %v833_v1 = vmul.f32 1.442695, %v832_v62 }
 0x90d   :  { %2723 = vpow2.f32 %v930_v63 }
 0x90e   :  { %2725 = vpow2.f32 %v833_v1 }
 0x916   :  { %v2720_v52 = vpop.eup %2719 }
 0x917   :  { %v2722_v58 = vpop.eup %2721  ;;  %938 = vrot.lane.b32.xlu0 %v2720_v52, %s2935_s24 }
 0x918   :  { %841 = vrot.lane.b32.xlu1 %v2722_v58, %s2935_s24 }
 0x91a   :  { %v2724_v53 = vpop.eup %2723 }
 0x91b   :  { %v2726_v2 = vpop.eup %2725  ;;  %v932_v5 = vadd.f32 1.0, %v2724_v53 }
 0x91c   :  { %v835_v6 = vadd.f32 1.0, %v2726_v2 }
 0x91d   :  { %2727 = vrcp.f32 %v932_v5 }
 0x91e   :  { %2729 = vrcp.f32 %v835_v6 }
 0x92a   :  { %v2728_v8 = vpop.eup %2727 }
 0x92b   :  { %v2730_v11 = vpop.eup %2729  ;;  %v936_v15 = vmul.f32 %v2728_v8, %v3273_v26 }
 0x92c   :  { %v839_v17 = vmul.f32 %v2730_v11, %v3269_v23 }
 0x989   :  { %v939_v10 = vpop.permute.xlu0 %938 }
 0x98a   :  { %v941_v12 = vmul.f32 %v2728_v8, %v939_v10  ;;  %v842_v54 = vpop.permute.xlu1 %841 }
 0x98b   :  { %v844_v13 = vmul.f32 %v2730_v11, %v842_v54 }
 0x98c   :  { %943 = vrot.lane.b32.xlu0 %v941_v12, %s2936_s1 }
 0x98d   :  { %846 = vrot.lane.b32.xlu1 %v844_v13, %s2936_s1 }
 0x9fe   :  { %v944_v16 = vpop.permute.xlu0 %943 }
 0x9ff   :  { %v3323_v18 = vadd.f32 %v944_v16, %v936_v15  ;;  %v847_v19 = vpop.permute.xlu1 %846 }
 0xa00   :  { %v3325_v20 = vadd.f32 %v847_v19, %v839_v17 }
 0xa01   :  { %2731 = vtanh.f32 %v3323_v18 }
 0xa02   :  { %2733 = vtanh.f32 %v3325_v20 }
 0xa0e   :  { %v2732_v21 = vpop.eup %2731 }
 0xa0f   :  { %v2734_v22 = vpop.eup %2733  ;;  %949 = vrot.lane.b32.xlu0 %v2732_v21, %s2935_s24 }
 0xa10   :  { %852 = vrot.lane.b32.xlu1 %v2734_v22, %s2935_s24 }
 0xa81   :  { %v950_v24 = vpop.permute.xlu0 %949 }
 0xa82   :  { %v952_v25 = vmul.f32 %v2728_v8, %v950_v24  ;;  %v853_v26 = vpop.permute.xlu1 %852 }
 0xa83   :  { %v3331_v27 = vmul.f32 %v2730_v11, %v853_v26 }
 0xa84   :  { %954 = vrot.lane.b32.xlu1 %v952_v25, %s2936_s1 }
 0xa85   :  { %958 = vrot.lane.b32.xlu0 %v3331_v27, %s2935_s24 }
 0xaf6   :  { %v955_v23 = vpop.permute.xlu1 %954 }
 0xaf7   :  { %2540 = vmatmul.mubr.msk.f32.vlgmr.msra.gmra.mxu0 %vm88_vm1, %v955_v23  ;;  %v959_v28 = vpop.permute.xlu0 %958 }
 0xaf8   :  { %v961_v29 = vsel %vm88_vm1, %v955_v23, %v959_v28  ;;  %2543 = vmatpush3.msra.mxu0 %v3078_v32  ;;  %2558 = vmatprep.mubr.msk.f32.mxu0 %vm2934_vm0, %v2933_v0 }
 0xaf9   :  { %2529 = vmatmul.mubr.msk.f32.vlgmr.msra.gmra.mxu1 %vm348_vm2, %v961_v29  ;;  %2544 = vmatprep.subr.mxu0 %v2933_v0 }
 0xafa   :  { %2545 = vmatpush3.msra.mxu0 %v3091_v35  ;;  %2562 = vmatpush3.msra.mxu1 %v3010_v3 }
 0xafb   :  { %2546 = vmatprep.subr.mxu0 %v2933_v0  ;;  %2563 = vmatprep.subr.mxu1 %v2933_v0 }
 0xafc   :  { %2547 = vmatpush3.msra.mxu0 %v3101_v37  ;;  %2564 = vmatpush3.msra.mxu1 %v3016_v4 }
 0xafd   :  { %2548 = vmatprep.subr.mxu0 %v2933_v0  ;;  %2565 = vmatprep.subr.mxu1 %v2933_v0 }
 0xafe   :  { %2549 = vmatpush3.msra.mxu0 %v3112_v39  ;;  %2566 = vmatpush3.msra.mxu1 %v3029_v7 }
 0xaff   :  { %2550 = vmatprep.subr.mxu0 %v2933_v0  ;;  %2567 = vmatprep.subr.mxu1 %v2933_v0 }
 0xb00   :  { %2551 = vmatpush3.msra.mxu0 %v3123_v41  ;;  %2568 = vmatpush3.msra.mxu1 %v3039_v9 }
 0xb01   :  { %2552 = vmatprep.subr.mxu0 %v2933_v0  ;;  %2569 = vmatprep.mubr.msk.f32.mxu1 %vm2934_vm0, %v2933_v0 }
 0xb02   :  { %2553 = vmatpush3.msra.mxu0 %v3134_v43  ;;  %2572 = vmatprep.subr.mxu1 %v2933_v0 }
 0xb03   :  { %2554 = vmatprep.subr.mxu0 %v2933_v0 }
 0xb04   :  { %2555 = vmatpush3.msra.mxu0 %v3142_v45 }
 0xb05   :  { %2556 = vmatprep.subr.mxu0 %v2933_v0 }
 0xb06   :  { %2557 = vmatpush3.msra.mxu0 %v3150_v47 }
 0xb07   :  { %2591 = vmatprep.subr.mxu0 %v2933_v0 }
 0xbb7   :  { %v1127_v36 = vpop.f32.mrf.mxu0 }
 0xbb8   :  { %v1131_v30 = vadd.f32 %v1127_v36, %v200_v34 }
 0xbb9   :  { %v1031_v38 = vpop.f32.mrf.mxu1  ;;  %v2541_v40 = vpop.f32.mrf.mxu0 }
 0xbba   :  { %2735 = vtanh.f32 %v1131_v30  ;;  %v1032_v42 = vadd.f32 %v3216_v60, %v1031_v38  ;;  %v1132_v49 = vsub.f32 0.0, %v1131_v30 }
 0xbbb   :  { %v2530_v31 = vpop.f32.mrf.mxu1 }
 0xbbc   :  { %2737 = vtanh.f32 %v1032_v42  ;;  %v1035_v50 = vsub.f32 0.0, %v1032_v42  ;;  %v1133_v51 = vmul.f32 1.442695, %v1132_v49 }
 0xbbe   :  { %v1036_v52 = vmul.f32 1.442695, %v1035_v50  ;;  %2739 = vpow2.f32 %v1133_v51 }
 0xbc0   :  { %2741 = vpow2.f32 %v1036_v52 }
 0xbc7   :  { %v2736_v46 = vpop.eup %2735 }
 0xbc8   :  { %1141 = vrot.lane.b32.xlu0 %v2736_v46, %s2935_s24 }
 0xbc9   :  { %v2738_v48 = vpop.eup %2737 }
 0xbca   :  { %1044 = vrot.lane.b32.xlu1 %v2738_v48, %s2935_s24 }
 0xbcb   :  { %v2740_v56 = vpop.eup %2739 }
 0xbcc   :  { %v1135_v61 = vadd.f32 1.0, %v2740_v56 }
 0xbcd   :  { %v2742_v58 = vpop.eup %2741 }
 0xbce   :  { %v1038_v62 = vadd.f32 1.0, %v2742_v58  ;;  %2743 = vrcp.f32 %v1135_v61 }
 0xbd0   :  { %2745 = vrcp.f32 %v1038_v62 }
 0xbdb   :  { %v2744_v63 = vpop.eup %2743 }
 0xbdc   :  { %v1139_v8 = vmul.f32 %v2744_v63, %v3323_v18 }
 0xbdd   :  { %v2746_v2 = vpop.eup %2745 }
 0xbde   :  { %v1042_v12 = vmul.f32 %v2746_v2, %v3325_v20 }
 0xc3a   :  { %v1142_v1 = vpop.permute.xlu0 %1141 }
 0xc3b   :  { %v1144_v53 = vmul.f32 %v2744_v63, %v1142_v1 }
 0xc3c   :  { %v1045_v5 = vpop.permute.xlu1 %1044 }
 0xc3d   :  { %v1047_v6 = vmul.f32 %v2746_v2, %v1045_v5  ;;  %1146 = vrot.lane.b32.xlu0 %v1144_v53, %s2936_s1 }
 0xc3f   :  { %1049 = vrot.lane.b32.xlu1 %v1047_v6, %s2936_s1 }
 0xcaf   :  { %v1147_v10 = vpop.permute.xlu0 %1146 }
 0xcb0   :  { %v3375_v11 = vadd.f32 %v1147_v10, %v1139_v8 }
 0xcb1   :  { %v1050_v54 = vpop.permute.xlu1 %1049 }
 0xcb2   :  { %2747 = vtanh.f32 %v3375_v11  ;;  %v3379_v13 = vadd.f32 %v1050_v54, %v1042_v12  ;;  %v2871_v54 = vld [vmem:[%s3749_s4 + $0x18] sm:$0xff] }
 0xcb4   :  { %2749 = vtanh.f32 %v3379_v13 }
 0xcbf   :  { %v2748_v15 = vpop.eup %2747 }
 0xcc0   :  { %1152 = vrot.lane.b32.xlu0 %v2748_v15, %s2935_s24 }
 0xcc1   :  { %v2750_v16 = vpop.eup %2749 }
 0xcc2   :  { %1055 = vrot.lane.b32.xlu1 %v2750_v16, %s2935_s24 }
 0xd32   :  { %v1153_v17 = vpop.permute.xlu0 %1152 }
 0xd33   :  { %v1155_v18 = vmul.f32 %v2744_v63, %v1153_v17 }
 0xd34   :  { %v1056_v19 = vpop.permute.xlu1 %1055 }
 0xd35   :  { %v3384_v21 = vmul.f32 %v2746_v2, %v1056_v19  ;;  %1157 = vrot.lane.b32.xlu1 %v1155_v18, %s2936_s1 }
 0xd37   :  { %1161 = vrot.lane.b32.xlu0 %v3384_v21, %s2935_s24 }
 0xda7   :  { %v1158_v20 = vpop.permute.xlu1 %1157 }
 0xda8   :  { %2570 = vmatmul.mubr.msk.f32.vlgmr.msra.gmra.mxu1 %vm88_vm1, %v1158_v20 }
 0xda9   :  { %v1162_v22 = vpop.permute.xlu0 %1161  ;;  %2573 = vmatpush3.msra.mxu1 %v3078_v32  ;;  %2588 = vmatprep.mubr.msk.f32.mxu1 %vm2934_vm0, %v2933_v0 }
 0xdaa   :  { %v1164_v24 = vsel %vm88_vm1, %v1158_v20, %v1162_v22  ;;  %2574 = vmatprep.subr.mxu1 %v2933_v0 }
 0xdab   :  { %2559 = vmatmul.mubr.msk.f32.vlgmr.msra.gmra.mxu0 %vm348_vm2, %v1164_v24  ;;  %2575 = vmatpush3.msra.mxu1 %v3091_v35 }
 0xdac   :  { %2576 = vmatprep.subr.mxu1 %v2933_v0  ;;  %2592 = vmatpush3.msra.mxu0 %v3010_v3  ;;  %v205_v3 = vadd.f32 %v3203_v55, %v3066_v14 }
 0xdad   :  { %2577 = vmatpush3.msra.mxu1 %v3101_v37  ;;  %2593 = vmatprep.subr.mxu0 %v2933_v0 }
 0xdae   :  { %2578 = vmatprep.subr.mxu1 %v2933_v0  ;;  %2594 = vmatpush3.msra.mxu0 %v3016_v4 }
 0xdaf   :  { %2579 = vmatpush3.msra.mxu1 %v3112_v39  ;;  %2595 = vmatprep.subr.mxu0 %v2933_v0 }
 0xdb0   :  { %2580 = vmatprep.subr.mxu1 %v2933_v0  ;;  %2596 = vmatpush3.msra.mxu0 %v3029_v7 }
 0xdb1   :  { %2581 = vmatpush3.msra.mxu1 %v3123_v41  ;;  %2597 = vmatprep.subr.mxu0 %v2933_v0 }
 0xdb2   :  { %2582 = vmatprep.subr.mxu1 %v2933_v0  ;;  %2598 = vmatpush3.msra.mxu0 %v3039_v9 }
 0xdb3   :  { %2583 = vmatpush3.msra.mxu1 %v3134_v43  ;;  %2599 = vmatprep.mubr.msk.f32.mxu0 %vm2934_vm0, %v2933_v0 }
 0xdb4   :  { %2584 = vmatprep.subr.mxu1 %v2933_v0  ;;  %2602 = vmatprep.subr.mxu0 %v2933_v0 }
 0xdb5   :  { %2585 = vmatpush3.msra.mxu1 %v3142_v45 }
 0xdb6   :  { %2586 = vmatprep.subr.mxu1 %v2933_v0 }
 0xdb7   :  { %2587 = vmatpush3.msra.mxu1 %v3150_v47 }
 0xdb8   :  { %2621 = vmatprep.subr.mxu1 %v2933_v0 }
 0xe68   :  { %v1330_v4 = vpop.f32.mrf.mxu1 }
 0xe69   :  { %v1334_v7 = vadd.f32 %v1330_v4, %v205_v3 }
 0xe6a   :  { %v2571_v9 = vpop.f32.mrf.mxu1 }
 0xe6b   :  { %2751 = vtanh.f32 %v1334_v7  ;;  %v1234_v25 = vpop.f32.mrf.mxu0  ;;  %v1335_v34 = vsub.f32 0.0, %v1334_v7 }
 0xe6c   :  { %v1235_v26 = vadd.f32 %v3216_v60, %v1234_v25 }
 0xe6d   :  { %v2560_v23 = vpop.f32.mrf.mxu0  ;;  %v1336_v30 = vmul.f32 1.442695, %v1335_v34 }
 0xe6e   :  { %2753 = vtanh.f32 %v1235_v26  ;;  %v1238_v36 = vsub.f32 0.0, %v1235_v26 }
 0xe6f   :  { %2755 = vpow2.f32 %v1336_v30 }
 0xe70   :  { %v1239_v38 = vmul.f32 1.442695, %v1238_v36 }
 0xe72   :  { %2757 = vpow2.f32 %v1239_v38 }
 0xe78   :  { %v2752_v28 = vpop.eup %2751 }
 0xe79   :  { %1344 = vrot.lane.b32.xlu0 %v2752_v28, %s2935_s24 }
 0xe7b   :  { %v2754_v29 = vpop.eup %2753 }
 0xe7c   :  { %1247 = vrot.lane.b32.xlu1 %v2754_v29, %s2935_s24  ;;  %v2756_v14 = vpop.eup %2755 }
 0xe7d   :  { %v1338_v40 = vadd.f32 1.0, %v2756_v14 }
 0xe7f   :  { %v2758_v55 = vpop.eup %2757  ;;  %2759 = vrcp.f32 %v1338_v40 }
 0xe80   :  { %v1241_v42 = vadd.f32 1.0, %v2758_v55 }
 0xe82   :  { %2761 = vrcp.f32 %v1241_v42 }
 0xe8c   :  { %v2760_v31 = vpop.eup %2759 }
 0xe8d   :  { %v1342_v52 = vmul.f32 %v2760_v31, %v3375_v11 }
 0xe8f   :  { %v2762_v49 = vpop.eup %2761 }
 0xe90   :  { %v1245_v61 = vmul.f32 %v2762_v49, %v3379_v13 }
 0xeeb   :  { %v1345_v46 = vpop.permute.xlu0 %1344 }
 0xeec   :  { %v1347_v48 = vmul.f32 %v2760_v31, %v1345_v46 }
 0xeee   :  { %v1248_v50 = vpop.permute.xlu1 %1247  ;;  %1349 = vrot.lane.b32.xlu0 %v1347_v48, %s2936_s1 }
 0xeef   :  { %v1250_v51 = vmul.f32 %v2762_v49, %v1248_v50 }
 0xef1   :  { %1252 = vrot.lane.b32.xlu1 %v1250_v51, %s2936_s1  ;;  %v2876_v51 = vld [vmem:[%s3751_s6 + $0x38] sm:$0xff] }
 0xf60   :  { %v1350_v56 = vpop.permute.xlu0 %1349 }
 0xf61   :  { %v3428_v58 = vadd.f32 %v1350_v56, %v1342_v52  ;;  %v2877_v52 = vld [vmem:[%s3751_s6 + $0x30] sm:$0xff] }
 0xf63   :  { %2763 = vtanh.f32 %v3428_v58  ;;  %v1253_v62 = vpop.permute.xlu1 %1252 }
 0xf64   :  { %v3432_v63 = vadd.f32 %v1253_v62, %v1245_v61  ;;  %v2878_v61 = vld [vmem:[%s3751_s6 + $0x28] sm:$0xff]  ;;  %v2879_v62 = vld [vmem:[%s3751_s6 + $0x20] sm:$0xff] }
 0xf66   :  { %2765 = vtanh.f32 %v3432_v63 }
 0xf70   :  { %v2764_v1 = vpop.eup %2763 }
 0xf71   :  { %1355 = vrot.lane.b32.xlu0 %v2764_v1, %s2935_s24  ;;  %v2881_v1 = vld [vmem:[%s3751_s6 + $0x10] sm:$0xff] }
 0xf73   :  { %v2766_v53 = vpop.eup %2765 }
 0xf74   :  { %1258 = vrot.lane.b32.xlu1 %v2766_v53, %s2935_s24  ;;  %v2882_v53 = vld [vmem:[%s3751_s6 + $0x8] sm:$0xff] }
 0xfe3   :  { %v1356_v2 = vpop.permute.xlu0 %1355 }
 0xfe4   :  { %v1358_v5 = vmul.f32 %v2760_v31, %v1356_v2  ;;  %v2883_v2 = vld [vmem:[%s3751_s6] sm:$0xff] }
 0xfe6   :  { %v1259_v6 = vpop.permute.xlu1 %1258  ;;  %1360 = vrot.lane.b32.xlu1 %v1358_v5, %s2936_s1 }
 0xfe7   :  { %v3438_v8 = vmul.f32 %v2762_v49, %v1259_v6 }
 0xfe9   :  { %1364 = vrot.lane.b32.xlu0 %v3438_v8, %s2935_s24 }
0x1058   :  { %v1361_v10 = vpop.permute.xlu1 %1360 }
0x1059   :  { %2600 = vmatmul.mubr.msk.f32.vlgmr.msra.gmra.mxu0 %vm88_vm1, %v1361_v10 }
0x105a   :  { %2603 = vmatpush3.msra.mxu0 %v3078_v32  ;;  %2618 = vmatprep.mubr.msk.f32.mxu0 %vm2934_vm0, %v2933_v0  ;;  %v2872_v32 = vld [vmem:[%s3749_s4 + $0x10] sm:$0xff] }
0x105b   :  { %v1365_v11 = vpop.permute.xlu0 %1364  ;;  %2604 = vmatprep.subr.mxu0 %v2933_v0 }
0x105c   :  { %v1367_v12 = vsel %vm88_vm1, %v1361_v10, %v1365_v11  ;;  %2605 = vmatpush3.msra.mxu0 %v3091_v35  ;;  %v2873_v35 = vld [vmem:[%s3749_s4 + $0x8] sm:$0xff] }
0x105d   :  { %2589 = vmatmul.mubr.msk.f32.vlgmr.msra.gmra.mxu1 %vm348_vm2, %v1367_v12  ;;  %2606 = vmatprep.subr.mxu0 %v2933_v0 }
0x105e   :  { %2622 = vmatpush3.msra.mxu1 %v2871_v54  ;;  %2607 = vmatpush3.msra.mxu0 %v3101_v37  ;;  %v2874_v37 = vld [vmem:[%s3749_s4] sm:$0xff] }
0x105f   :  { %2623 = vmatprep.subr.mxu1 %v2933_v0  ;;  %2608 = vmatprep.subr.mxu0 %v2933_v0 }
0x1060   :  { %2624 = vmatpush3.msra.mxu1 %v2872_v32  ;;  %2609 = vmatpush3.msra.mxu0 %v3112_v39  ;;  %v3483_v39 = vld [vmem:[%s3750_s5] ss:$0 sm:$0xff] }
0x1061   :  { %2625 = vmatprep.subr.mxu1 %v2933_v0  ;;  %2610 = vmatprep.subr.mxu0 %v2933_v0  ;;  %v215_v5 = vadd.f32 %v3483_v39, %v3207_v57 }
0x1062   :  { %2626 = vmatpush3.msra.mxu1 %v2873_v35  ;;  %2611 = vmatpush3.msra.mxu0 %v3123_v41  ;;  %v210_v41 = vadd.f32 %v3483_v39, %v3211_v59 }
0x1063   :  { %2627 = vmatprep.subr.mxu1 %v2933_v0  ;;  %2612 = vmatprep.subr.mxu0 %v2933_v0 }
0x1064   :  { %2628 = vmatpush3.msra.mxu1 %v2874_v37  ;;  %2629 = vmatprep.mubr.msk.f32.mxu1 %vm2934_vm0, %v2933_v0 }
0x1065   :  { %2613 = vmatpush3.msra.mxu0 %v3134_v43  ;;  %2632 = vmatprep.subr.mxu1 %v2933_v0 }
0x1066   :  { %2614 = vmatprep.subr.mxu0 %v2933_v0 }
0x1067   :  { %2615 = vmatpush3.msra.mxu0 %v3142_v45 }
0x1068   :  { %2616 = vmatprep.subr.mxu0 %v2933_v0 }
0x1069   :  { %2617 = vmatpush3.msra.mxu0 %v3150_v47 }
0x1119   :  { %v1533_v13 = vpop.f32.mrf.mxu0 }
0x111a   :  { %v1537_v43 = vadd.f32 %v1533_v13, %v210_v41 }
0x111b   :  { %v2601_v15 = vpop.f32.mrf.mxu0 }
0x111c   :  { %2767 = vtanh.f32 %v1537_v43  ;;  %v1538_v19 = vsub.f32 0.0, %v1537_v43 }
0x111d   :  { %v1437_v16 = vpop.f32.mrf.mxu1 }
0x111e   :  { %v1438_v17 = vadd.f32 %v3216_v60, %v1437_v16  ;;  %v1539_v20 = vmul.f32 1.442695, %v1538_v19 }
0x111f   :  { %v2590_v45 = vpop.f32.mrf.mxu1 }
0x1120   :  { %2769 = vtanh.f32 %v1438_v17  ;;  %v1441_v22 = vsub.f32 0.0, %v1438_v17 }
0x1121   :  { %2771 = vpow2.f32 %v1539_v20 }
0x1122   :  { %v1442_v59 = vmul.f32 1.442695, %v1441_v22 }
0x1124   :  { %2773 = vpow2.f32 %v1442_v59 }
0x1129   :  { %v2768_v18 = vpop.eup %2767 }
0x112a   :  { %1547 = vrot.lane.b32.xlu0 %v2768_v18, %s2935_s24 }
0x112d   :  { %v2770_v47 = vpop.eup %2769 }
0x112e   :  { %1450 = vrot.lane.b32.xlu1 %v2770_v47, %s2935_s24  ;;  %v2772_v24 = vpop.eup %2771 }
0x112f   :  { %v1541_v3 = vadd.f32 1.0, %v2772_v24 }
0x1131   :  { %v2774_v4 = vpop.eup %2773  ;;  %2775 = vrcp.f32 %v1541_v3 }
0x1132   :  { %v1444_v7 = vadd.f32 1.0, %v2774_v4 }
0x1134   :  { %2777 = vrcp.f32 %v1444_v7 }
0x113e   :  { %v2776_v9 = vpop.eup %2775 }
0x113f   :  { %v1545_v34 = vmul.f32 %v2776_v9, %v3428_v58 }
0x1141   :  { %v2778_v23 = vpop.eup %2777 }
0x1142   :  { %v1448_v38 = vmul.f32 %v2778_v23, %v3432_v63  ;;  %v2880_v63 = vld [vmem:[%s3751_s6 + $0x18] sm:$0xff] }
0x119c   :  { %v1548_v25 = vpop.permute.xlu0 %1547 }
0x119d   :  { %v1550_v26 = vmul.f32 %v2776_v9, %v1548_v25 }
0x119f   :  { %1552 = vrot.lane.b32.xlu0 %v1550_v26, %s2936_s1 }
0x11a0   :  { %v1451_v28 = vpop.permute.xlu1 %1450 }
0x11a1   :  { %v1453_v29 = vmul.f32 %v2778_v23, %v1451_v28 }
0x11a3   :  { %1455 = vrot.lane.b32.xlu1 %v1453_v29, %s2936_s1 }
0x1211   :  { %v1553_v36 = vpop.permute.xlu0 %1552 }
0x1212   :  { %v3493_v30 = vadd.f32 %v1553_v36, %v1545_v34 }
0x1214   :  { %2779 = vtanh.f32 %v3493_v30 }
0x1215   :  { %v1456_v14 = vpop.permute.xlu1 %1455 }
0x1216   :  { %v3497_v55 = vadd.f32 %v1456_v14, %v1448_v38  ;;  %v2884_v38 = vld [vmem:[%s3752_s7] ss:$0 sm:$0xff] }
0x1218   :  { %2781 = vtanh.f32 %v3497_v55 }
0x1221   :  { %v2780_v40 = vpop.eup %2779 }
0x1222   :  { %1558 = vrot.lane.b32.xlu0 %v2780_v40, %s2935_s24 }
0x1225   :  { %v2782_v42 = vpop.eup %2781 }
0x1226   :  { %1461 = vrot.lane.b32.xlu1 %v2782_v42, %s2935_s24 }
0x1294   :  { %v1559_v31 = vpop.permute.xlu0 %1558 }
0x1295   :  { %v1561_v46 = vmul.f32 %v2776_v9, %v1559_v31 }
0x1297   :  { %1563 = vrot.lane.b32.xlu1 %v1561_v46, %s2936_s1 }
0x1298   :  { %v1462_v48 = vpop.permute.xlu1 %1461 }
0x1299   :  { %v3503_v49 = vmul.f32 %v2778_v23, %v1462_v48 }
0x129b   :  { %1567 = vrot.lane.b32.xlu0 %v3503_v49, %s2935_s24 }
0x1309   :  { %v1564_v50 = vpop.permute.xlu1 %1563 }
0x130a   :  { %2630 = vmatmul.mubr.msk.f32.vlgmr.msra.gmra.mxu1 %vm88_vm1, %v1564_v50 }
0x130b   :  { %2633 = vmatpush3.msra.mxu1 %v2876_v51  ;;  %2648 = vmatprep.mubr.msk.f32.mxu1 %vm2934_vm0, %v2933_v0 }
0x130c   :  { %2634 = vmatprep.subr.mxu1 %v2933_v0 }
0x130d   :  { %2635 = vmatpush3.msra.mxu1 %v2877_v52  ;;  %v1568_v56 = vpop.permute.xlu0 %1567 }
0x130e   :  { %2636 = vmatprep.subr.mxu1 %v2933_v0  ;;  %v1570_v58 = vsel %vm88_vm1, %v1564_v50, %v1568_v56  ;;  %v1874_v56 = vld [vmem:[%s3753_s8 + $0x18] sm:$0xff] }
0x130f   :  { %2637 = vmatpush3.msra.mxu1 %v2878_v61  ;;  %2619 = vmatmul.mubr.msk.f32.vlgmr.msra.gmra.mxu0 %vm348_vm2, %v1570_v58  ;;  %v1873_v58 = vld [vmem:[%s3753_s8 + $0x10] sm:$0xff] }
0x1310   :  { %2638 = vmatprep.subr.mxu1 %v2933_v0  ;;  %2651 = vmatprep.subr.mxu0 %v1874_v56 }
0x1311   :  { %2639 = vmatpush3.msra.mxu1 %v2879_v62  ;;  %2652 = vmatpush3.msra.mxu0 %v1874_v56 }
0x1312   :  { %2640 = vmatprep.subr.mxu1 %v2933_v0  ;;  %2653 = vmatprep.subr.mxu0 %v1873_v58 }
0x1313   :  { %2641 = vmatpush3.msra.mxu1 %v2880_v63  ;;  %2654 = vmatpush3.msra.mxu0 %v1873_v58  ;;  %v1871_v63 = vld [vmem:[%s3753_s8] sm:$0xff] }
0x1314   :  { %2642 = vmatprep.subr.mxu1 %v2933_v0 }
0x1315   :  { %2643 = vmatpush3.msra.mxu1 %v2881_v1 }
0x1316   :  { %2644 = vmatprep.subr.mxu1 %v2933_v0 }
0x1317   :  { %2645 = vmatpush3.msra.mxu1 %v2882_v53 }
0x1318   :  { %2646 = vmatprep.subr.mxu1 %v2933_v0 }
0x1319   :  { %2647 = vmatpush3.msra.mxu1 %v2883_v2 }
0x13ca   :  { %v1736_v6 = vpop.f32.mrf.mxu1 }
0x13cb   :  { %v1740_v10 = vadd.f32 %v1736_v6, %v215_v5 }
0x13cc   :  { %v2631_v11 = vpop.f32.mrf.mxu1 }
0x13cd   :  { %2783 = vtanh.f32 %v1740_v10  ;;  %v1741_v37 = vsub.f32 0.0, %v1740_v10 }
0x13cf   :  { %v1640_v12 = vpop.f32.mrf.mxu0  ;;  %v1742_v41 = vmul.f32 1.442695, %v1741_v37 }
0x13d0   :  { %v1641_v54 = vadd.f32 %v3216_v60, %v1640_v12  ;;  %v2246_v12 = vld [vmem:[%s3754_s9] ss:$0 sm:$0xff] }
0x13d1   :  { %v2620_v32 = vpop.f32.mrf.mxu0 }
0x13d2   :  { %2785 = vtanh.f32 %v1641_v54  ;;  %v1644_v13 = vsub.f32 0.0, %v1641_v54 }
0x13d3   :  { %2787 = vpow2.f32 %v1742_v41 }
0x13d4   :  { %v1645_v57 = vmul.f32 1.442695, %v1644_v13 }
0x13d6   :  { %2789 = vpow2.f32 %v1645_v57 }
0x13da   :  { %v2784_v35 = vpop.eup %2783 }
0x13db   :  { %1750 = vrot.lane.b32.xlu0 %v2784_v35, %s2935_s24 }
0x13df   :  { %v2786_v0 = vpop.eup %2785 }
0x13e0   :  { %1653 = vrot.lane.b32.xlu1 %v2786_v0, %s2935_s24  ;;  %v2788_v39 = vpop.eup %2787 }
0x13e1   :  { %v1744_v43 = vadd.f32 1.0, %v2788_v39 }
0x13e3   :  { %v2790_v15 = vpop.eup %2789  ;;  %2791 = vrcp.f32 %v1744_v43 }
0x13e4   :  { %v1647_v16 = vadd.f32 1.0, %v2790_v15 }
0x13e6   :  { %2793 = vrcp.f32 %v1647_v16 }
0x13f0   :  { %v2792_v60 = vpop.eup %2791 }
0x13f1   :  { %v1748_v20 = vmul.f32 %v2792_v60, %v3493_v30 }
0x13f3   :  { %v2794_v18 = vpop.eup %2793 }
0x13f4   :  { %v1651_v24 = vmul.f32 %v2794_v18, %v3497_v55 }
0x144d   :  { %v1751_v17 = vpop.permute.xlu0 %1750 }
0x144e   :  { %v1753_v45 = vmul.f32 %v2792_v60, %v1751_v17 }
0x1450   :  { %1755 = vrot.lane.b32.xlu0 %v1753_v45, %s2936_s1 }
0x1452   :  { %v1654_v47 = vpop.permute.xlu1 %1653 }
0x1453   :  { %v1656_v19 = vmul.f32 %v2794_v18, %v1654_v47 }
0x1455   :  { %1658 = vrot.lane.b32.xlu1 %v1656_v19, %s2936_s1 }
0x14c2   :  { %v1756_v22 = vpop.permute.xlu0 %1755 }
0x14c3   :  { %v1758_v59 = vadd.f32 %v1756_v22, %v1748_v20 }
0x14c5   :  { %2795 = vtanh.f32 %v1758_v59 }
0x14c7   :  { %v1659_v3 = vpop.permute.xlu1 %1658 }
0x14c8   :  { %v1661_v4 = vadd.f32 %v1659_v3, %v1651_v24 }
0x14ca   :  { %2797 = vtanh.f32 %v1661_v4 }
0x14d2   :  { %v2796_v7 = vpop.eup %2795 }
0x14d3   :  { %1761 = vrot.lane.b32.xlu0 %v2796_v7, %s2935_s24 }
0x14d7   :  { %v2798_v9 = vpop.eup %2797 }
0x14d8   :  { %1664 = vrot.lane.b32.xlu1 %v2798_v9, %s2935_s24 }
0x1545   :  { %v1762_v25 = vpop.permute.xlu0 %1761 }
0x1546   :  { %v1764_v26 = vmul.f32 %v2792_v60, %v1762_v25 }
0x1548   :  { %1766 = vrot.lane.b32.xlu1 %v1764_v26, %s2936_s1 }
0x154a   :  { %v1665_v23 = vpop.permute.xlu1 %1664 }
0x154b   :  { %v1667_v28 = vmul.f32 %v2794_v18, %v1665_v23 }
0x154d   :  { %1770 = vrot.lane.b32.xlu0 %v1667_v28, %s2935_s24 }
0x15ba   :  { %v1767_v29 = vpop.permute.xlu1 %1766 }
0x15bf   :  { %v1771_v34 = vpop.permute.xlu0 %1770 }
0x15c0   :  { %v1773_v36 = vsel %vm88_vm1, %v1767_v29, %v1771_v34 }
0x15c1   :  { %2649 = vmatmul.mubr.msk.f32.vlgmr.msra.gmra.mxu1 %vm348_vm2, %v1773_v36 }
0x1681   :  { %v1843_v30 = vpop.f32.mrf.mxu1 }
0x1682   :  { %v1844_v14 = vadd.f32 %v2884_v38, %v1843_v30 }
0x1683   :  { %v2650_v55 = vpop.f32.mrf.mxu1 }
0x1684   :  { %2799 = vtanh.f32 %v1844_v14  ;;  %v1847_v42 = vsub.f32 0.0, %v1844_v14 }
0x1686   :  { %v1848_v31 = vmul.f32 1.442695, %v1847_v42 }
0x1688   :  { %2801 = vpow2.f32 %v1848_v31 }
0x1691   :  { %v2800_v40 = vpop.eup %2799 }
0x1692   :  { %1856 = vrot.lane.b32.xlu1 %v2800_v40, %s2935_s24 }
0x1695   :  { %v2802_v46 = vpop.eup %2801 }
0x1696   :  { %v1850_v48 = vadd.f32 1.0, %v2802_v46 }
0x1698   :  { %2803 = vrcp.f32 %v1850_v48 }
0x16a5   :  { %v2804_v50 = vpop.eup %2803 }
0x1704   :  { %v1857_v51 = vpop.permute.xlu1 %1856 }
0x1705   :  { %v1859_v52 = vmul.f32 %v2804_v50, %v1857_v51 }
0x1707   :  { %1861 = vrot.lane.b32.xlu0 %v1859_v52, %s2936_s1 }
0x170b   :  { %1883 = vrot.lane.b32.xlu0 %v3233_v44, %s2936_s1  ;;  %v1854_v44 = vmul.f32 %v2804_v50, %v1661_v4 }
0x170f   :  { %1887 = vrot.lane.b32.xlu0 %v3331_v27, %s2936_s1 }
0x1713   :  { %1891 = vrot.lane.b32.xlu0 %v3438_v8, %s2936_s1  ;;  %v1872_v8 = vld [vmem:[%s3753_s8 + $0x8] sm:$0xff] }
0x1714   :  { %2655 = vmatprep.subr.mxu0 %v1872_v8 }
0x1715   :  { %2656 = vmatpush3.msra.mxu0 %v1872_v8 }
0x1716   :  { %2657 = vmatprep.subr.mxu0 %v1871_v63 }
0x1717   :  { %1895 = vrot.lane.b32.xlu0 %v1667_v28, %s2936_s1  ;;  %2658 = vmatpush3.msra.mxu0 %v1871_v63 }
0x1779   :  { %v1862_v61 = vpop.permute.xlu0 %1861 }
0x177a   :  { %v1864_v27 = vadd.f32 %v1862_v61, %v1854_v44 }
0x177c   :  { %2805 = vtanh.f32 %v1864_v27 }
0x177d   :  { %v1884_v62 = vpop.permute.xlu0 %1883 }
0x177e   :  { %2659 = vmatprep.mubr.msk.f32.mxu0 %vm88_vm1, %v1884_v62 }
0x1781   :  { %v1888_v2 = vpop.permute.xlu0 %1887 }
0x1785   :  { %v1892_v10 = vpop.permute.xlu0 %1891 }
0x1789   :  { %v2806_v1 = vpop.eup %2805 }
0x178a   :  { %1867 = vrot.lane.b32.xlu1 %v2806_v1, %s2935_s24 }
0x178e   :  { %1885 = vrot.lane.b32.xlu1 %v3278_v33, %s2936_s1 }
0x1792   :  { %1889 = vrot.lane.b32.xlu1 %v3384_v21, %s2936_s1  ;;  %v1896_v21 = vpop.permute.xlu0 %1895 }
0x1796   :  { %1893 = vrot.lane.b32.xlu1 %v3503_v49, %s2936_s1 }
0x17fc   :  { %v1868_v53 = vpop.permute.xlu1 %1867 }
0x17fd   :  { %v1870_v5 = vmul.f32 %v2804_v50, %v1868_v53 }
0x17ff   :  { %1897 = vrot.lane.b32.xlu1 %v1870_v5, %s2936_s1 }
0x1800   :  { %v1886_v6 = vpop.permute.xlu1 %1885 }
0x1801   :  { %2660 = vmatmul.mubr.msk.f32.vlgmr.msra.gmra.mxu0 %vm88_vm1, %v1886_v6 }
0x1802   :  { %2662 = vmatprep.mubr.msk.f32.mxu0 %vm88_vm1, %v1888_v2 }
0x1804   :  { %v1890_v11 = vpop.permute.xlu1 %1889 }
0x1805   :  { %2663 = vmatmul.mubr.msk.f32.gmra.mxu0 %vm88_vm1, %v1890_v11 }
0x1806   :  { %2665 = vmatprep.mubr.msk.f32.mxu0 %vm88_vm1, %v1892_v10 }
0x1808   :  { %v1894_v33 = vpop.permute.xlu1 %1893 }
0x1809   :  { %2666 = vmatmul.mubr.msk.f32.gmra.mxu0 %vm88_vm1, %v1894_v33 }
0x180a   :  { %2668 = vmatprep.mubr.msk.f32.mxu0 %vm88_vm1, %v1896_v21 }
0x1871   :  { %v1898_v49 = vpop.permute.xlu1 %1897 }
0x1872   :  { %2669 = vmatmul.mubr.msk.f32.gmra.mxu0 %vm88_vm1, %v1898_v49 }
0x18c1   :  { %v2661_v54 = vpop.f32.mrf.mxu0 }
0x18c2   :  { %v3601_v32 = vadd.f32 %v2661_v54, %v2246_v12 }
0x18c3   :  { %v1981_v35 = vpop.f32.mrf.mxu0 }
0x18c4   :  { %v3603_v0 = vadd.f32 %v2246_v12, %v1981_v35  ;;  %v2024_v37 = vsel %vm2020_vm3, %v3601_v32, -inf  ;;  %v2134_v33 = vand.u32 2147483647, %v3601_v32 }
0x18c5   :  { %2025 = vmax.xlane.f32.xlu1 %v2024_v37  ;;  %v2664_v41 = vpop.f32.mrf.mxu0 }
0x18c6   :  { %v2021_v13 = vsel %vm2020_vm3, %v3603_v0, -inf  ;;  %v3611_v15 = vadd.f32 %v2664_v41, %v2246_v12  ;;  %v2133_v21 = vand.u32 2147483647, %v3603_v0  ;;  %v2142_v49 = vsub.f32 0.0, %v2134_v33 }
0x18c7   :  { %v1991_v57 = vpop.f32.mrf.mxu0  ;;  %2022 = vmax.xlane.f32.xlu0 %v2021_v13 }
0x18c8   :  { %v3609_v39 = vadd.f32 %v2246_v12, %v1991_v57  ;;  %v2030_v18 = vsel %vm2020_vm3, %v3611_v15, -inf  ;;  %v2141_v54 = vsub.f32 0.0, %v2133_v21  ;;  %v2151_v37 = vmul.f32 1.442695, %v2142_v49 }
0x18c9   :  { %v2667_v43 = vpop.f32.mrf.mxu0 }
0x18ca   :  { %v2027_v16 = vsel %vm2020_vm3, %v3609_v39, -inf  ;;  %v3617_v45 = vadd.f32 %v2667_v43, %v2246_v12  ;;  %v2135_v35 = vand.u32 2147483647, %v3609_v39  ;;  %v2149_v43 = vmul.f32 1.442695, %v2141_v54 }
0x18cb   :  { %v2001_v60 = vpop.f32.mrf.mxu0  ;;  %2028 = vmax.xlane.f32.xlu0 %v2027_v16  ;;  %v2136_v16 = vand.u32 2147483647, %v3611_v15 }
0x18cc   :  { %v3615_v17 = vadd.f32 %v2246_v12, %v2001_v60  ;;  %v2036_v19 = vsel %vm2020_vm3, %v3617_v45, -inf  ;;  %v2143_v60 = vsub.f32 0.0, %v2135_v35  ;;  %v2125_v35 = vmin.f32 %v3603_v0, 0.0 }
0x18ce   :  { %v2033_v47 = vsel %vm2020_vm3, %v3615_v17, -inf }
0x18cf   :  { %2031 = vmax.xlane.f32.xlu0 %v2030_v18  ;;  %2034 = vmax.xlane.f32.xlu1 %v2033_v47  ;;  %v2137_v18 = vand.u32 2147483647, %v3615_v17  ;;  %v2144_v47 = vsub.f32 0.0, %v2136_v16 }
0x18d3   :  { %2037 = vmax.xlane.f32.xlu0 %v2036_v19  ;;  %v2153_v19 = vmul.f32 1.442695, %v2143_v60 }
0x1932   :  { %v2670_v20 = vpop.f32.mrf.mxu0 }
0x1933   :  { %v3625_v22 = vadd.f32 %v2670_v20, %v2246_v12  ;;  %v2138_v20 = vand.u32 2147483647, %v3617_v45 }
0x1934   :  { %v2011_v59 = vpop.f32.mrf.mxu0 }
0x1935   :  { %v3627_v24 = vadd.f32 %v2246_v12, %v2011_v59  ;;  %v2042_v3 = vsel %vm2020_vm3, %v3625_v22, -inf  ;;  %v2145_v59 = vsub.f32 0.0, %v2137_v18 }
0x1936   :  { %2043 = vmax.xlane.f32.xlu0 %v2042_v3  ;;  %v2155_v3 = vmul.f32 1.442695, %v2144_v47 }
0x1937   :  { %v2039_v4 = vsel %vm2020_vm3, %v3627_v24, -inf }
0x1938   :  { %2040 = vmax.xlane.f32.xlu1 %v2039_v4  ;;  %v2146_v4 = vsub.f32 0.0, %v2138_v20 }
0x194e   :  { %v3633_v7 = vpop.xlane.xlu1 %2025 }
0x194f   :  { %v2046_v9 = vsub.f32 %v3601_v32, %v3633_v7 }
0x1950   :  { %v3637_v26 = vpop.xlane.xlu0 %2022 }
0x1951   :  { %v2055_v25 = vmul.f32 1.442695, %v2046_v9  ;;  %v2045_v23 = vsub.f32 %v3603_v0, %v3637_v26  ;;  %v2157_v9 = vmul.f32 1.442695, %v2145_v59 }
0x1953   :  { %2807 = vpow2.f32 %v2055_v25  ;;  %v2053_v28 = vmul.f32 1.442695, %v2045_v23  ;;  %v2159_v25 = vmul.f32 1.442695, %v2146_v4 }
0x1954   :  { %v3641_v29 = vpop.xlane.xlu0 %2028 }
0x1955   :  { %2809 = vpow2.f32 %v2053_v28  ;;  %v2047_v34 = vsub.f32 %v3609_v39, %v3641_v29 }
0x1957   :  { %v2057_v36 = vmul.f32 1.442695, %v2047_v34 }
0x1958   :  { %v3645_v30 = vpop.xlane.xlu0 %2031  ;;  %v3647_v38 = vpop.xlane.xlu1 %2034 }
0x1959   :  { %2811 = vpow2.f32 %v2057_v36  ;;  %v2048_v14 = vsub.f32 %v3611_v15, %v3645_v30  ;;  %v2049_v55 = vsub.f32 %v3615_v17, %v3647_v38 }
0x195b   :  { %v2059_v40 = vmul.f32 1.442695, %v2048_v14  ;;  %v2061_v42 = vmul.f32 1.442695, %v2049_v55 }
0x195c   :  { %v3653_v31 = vpop.xlane.xlu0 %2037 }
0x195d   :  { %2813 = vpow2.f32 %v2059_v40  ;;  %v2050_v46 = vsub.f32 %v3617_v45, %v3653_v31 }
0x195e   :  { %2815 = vpow2.f32 %v2061_v42 }
0x195f   :  { %v2063_v50 = vmul.f32 1.442695, %v2050_v46 }
0x1960   :  { %v2808_v48 = vpop.eup %2807 }
0x1961   :  { %v2072_v51 = vsel %vm2020_vm3, %v2808_v48, 0.0  ;;  %2817 = vpow2.f32 %v2063_v50 }
0x1962   :  { %2073 = vadd.xlane.f32.xlu0 %v2072_v51  ;;  %v2810_v52 = vpop.eup %2809 }
0x1963   :  { %v2069_v56 = vsel %vm2020_vm3, %v2810_v52, 0.0 }
0x1964   :  { %2070 = vadd.xlane.f32.xlu1 %v2069_v56 }
0x1966   :  { %v2812_v58 = vpop.eup %2811 }
0x1967   :  { %v2075_v44 = vsel %vm2020_vm3, %v2812_v58, 0.0 }
0x1968   :  { %2076 = vadd.xlane.f32.xlu1 %v2075_v44 }
0x196a   :  { %v2814_v61 = vpop.eup %2813 }
0x196b   :  { %v2816_v27 = vpop.eup %2815  ;;  %v2078_v8 = vsel %vm2020_vm3, %v2814_v61, 0.0 }
0x196c   :  { %2079 = vadd.xlane.f32.xlu0 %v2078_v8  ;;  %v2081_v62 = vsel %vm2020_vm3, %v2816_v27, 0.0 }
0x196d   :  { %2082 = vadd.xlane.f32.xlu1 %v2081_v62 }
0x196e   :  { %v2818_v63 = vpop.eup %2817 }
0x196f   :  { %v2084_v1 = vsel %vm2020_vm3, %v2818_v63, 0.0 }
0x1970   :  { %2085 = vadd.xlane.f32.xlu0 %v2084_v1 }
0x19bf   :  { %v3663_v53 = vpop.xlane.xlu0 %2043 }
0x19c0   :  { %v2052_v2 = vsub.f32 %v3625_v22, %v3663_v53 }
0x19c1   :  { %v3667_v5 = vpop.xlane.xlu1 %2040 }
0x19c2   :  { %v2067_v6 = vmul.f32 1.442695, %v2052_v2  ;;  %v2051_v10 = vsub.f32 %v3627_v24, %v3667_v5 }
0x19c4   :  { %2819 = vpow2.f32 %v2067_v6  ;;  %v2065_v11 = vmul.f32 1.442695, %v2051_v10  ;;  %v2126_v10 = vmin.f32 %v3601_v32, 0.0 }
0x19c6   :  { %2821 = vpow2.f32 %v2065_v11 }
0x19c7   :  { %2823 = vpow2.f32 %v2151_v37 }
0x19c8   :  { %2825 = vpow2.f32 %v2149_v43 }
0x19c9   :  { %2827 = vpow2.f32 %v2153_v19 }
0x19ca   :  { %2829 = vpow2.f32 %v2155_v3 }
0x19cb   :  { %2831 = vpow2.f32 %v2157_v9 }
0x19cc   :  { %2833 = vpow2.f32 %v2159_v25 }
0x19d1   :  { %v2820_v12 = vpop.eup %2819 }
0x19d2   :  { %v2090_v41 = vsel %vm2020_vm3, %v2820_v12, 0.0 }
0x19d3   :  { %v2822_v13 = vpop.eup %2821  ;;  %2091 = vadd.xlane.f32.xlu0 %v2090_v41 }
0x19d4   :  { %v2087_v57 = vsel %vm2020_vm3, %v2822_v13, 0.0  ;;  %v2824_v23 = vpop.eup %2823 }
0x19d5   :  { %2088 = vadd.xlane.f32.xlu1 %v2087_v57  ;;  %v2826_v28 = vpop.eup %2825  ;;  %v2166_v34 = vadd.f32 1.0, %v2824_v23 }
0x19d6   :  { %v2165_v36 = vadd.f32 1.0, %v2826_v28  ;;  %v2828_v14 = vpop.eup %2827  ;;  %v2128_v28 = vmin.f32 %v3611_v15, 0.0 }
0x19d7   :  { %2835 = vlog2.f32 %v2166_v34  ;;  %v2167_v40 = vadd.f32 1.0, %v2828_v14  ;;  %v2830_v42 = vpop.eup %2829  ;;  %v2129_v14 = vmin.f32 %v3615_v17, 0.0 }
0x19d8   :  { %v2832_v48 = vpop.eup %2831  ;;  %v2168_v50 = vadd.f32 1.0, %v2830_v42 }
0x19d9   :  { %v2834_v51 = vpop.eup %2833  ;;  %v2169_v52 = vadd.f32 1.0, %v2832_v48 }
0x19da   :  { %v2170_v58 = vadd.f32 1.0, %v2834_v51 }
0x19e4   :  { %v2836_v61 = vpop.eup %2835 }
0x19e5   :  { %v2176_v63 = vmul.f32 0.6931472, %v2836_v61 }
0x19e7   :  { %v2190_v12 = vsub.f32 %v2126_v10, %v2176_v63 }
0x19eb   :  { %v2074_v55 = vpop.xlane.xlu0 %2073 }
0x19ec   :  { %2837 = vlog2.f32 %v2074_v55 }
0x19ed   :  { %2839 = vlog2.f32 %v2165_v36  ;;  %v2071_v46 = vpop.xlane.xlu1 %2070 }
0x19ee   :  { %2841 = vlog2.f32 %v2071_v46 }
0x19ef   :  { %2843 = vlog2.f32 %v2167_v40 }
0x19f1   :  { %v2077_v56 = vpop.xlane.xlu1 %2076 }
0x19f2   :  { %2845 = vlog2.f32 %v2077_v56 }
0x19f3   :  { %2847 = vlog2.f32 %v2168_v50 }
0x19f4   :  { %2849 = vlog2.f32 %v2169_v52 }
0x19f5   :  { %v2080_v44 = vpop.xlane.xlu0 %2079 }
0x19f6   :  { %2851 = vlog2.f32 %v2080_v44  ;;  %v2083_v27 = vpop.xlane.xlu1 %2082 }
0x19f7   :  { %2853 = vlog2.f32 %v2083_v27 }
0x19f8   :  { %2855 = vlog2.f32 %v2170_v58  ;;  %v2139_v58 = vand.u32 2147483647, %v3627_v24 }
0x19f9   :  { %v2838_v8 = vpop.eup %2837  ;;  %v2086_v2 = vpop.xlane.xlu0 %2085 }
0x19fa   :  { %v2840_v62 = vpop.eup %2839  ;;  %v2096_v1 = vmul.f32 0.6931472, %v2838_v8  ;;  %2857 = vlog2.f32 %v2086_v2  ;;  %v2147_v61 = vsub.f32 0.0, %v2139_v58 }
0x19fb   :  { %v2842_v6 = vpop.eup %2841  ;;  %v2174_v33 = vmul.f32 0.6931472, %v2840_v62 }
0x19fc   :  { %v2110_v11 = vadd.f32 %v2096_v1, %v3633_v7  ;;  %v2094_v21 = vmul.f32 0.6931472, %v2842_v6  ;;  %v2844_v49 = vpop.eup %2843  ;;  %v2161_v8 = vmul.f32 1.442695, %v2147_v61 }
0x19fd   :  { %v2189_v57 = vsub.f32 %v2125_v35, %v2174_v33  ;;  %v2178_v43 = vmul.f32 0.6931472, %v2844_v49 }
0x19fe   :  { %v2118_v54 = vsub.f32 %v3601_v32, %v2110_v11  ;;  %v2109_v37 = vadd.f32 %v2094_v21, %v3637_v26  ;;  %v2127_v32 = vmin.f32 %v3609_v39, 0.0 }
0x19ff   :  { %v2846_v41 = vpop.eup %2845 }
0x1a00   :  { %v2198_v13 = vsel %vm2020_vm3, %v2118_v54, %v2190_v12  ;;  %v2117_v7 = vsub.f32 %v3603_v0, %v2109_v37  ;;  %v2098_v16 = vmul.f32 0.6931472, %v2846_v41  ;;  %v2848_v60 = vpop.eup %2847  ;;  %v2191_v3 = vsub.f32 %v2127_v32, %v2178_v43 }
0x1a01   :  { %2207 = vst.msk [vmem:[%s3755_s10 + $0x8] sm:$0xff] %vm2205_vm4, %v2198_v13  ;;  %v2850_v18 = vpop.eup %2849  ;;  %v2180_v59 = vmul.f32 0.6931472, %v2848_v60  ;;  %v2132_v54 = vmin.f32 %v3625_v22, 0.0 }
0x1a02   :  { %v2197_v47 = vsel %vm2020_vm3, %v2117_v7, %v2189_v57  ;;  %v2111_v26 = vadd.f32 %v2098_v16, %v3641_v29  ;;  %v2182_v25 = vmul.f32 0.6931472, %v2850_v18  ;;  %v2131_v57 = vmin.f32 %v3627_v24, 0.0 }
0x1a03   :  { %v2852_v19 = vpop.eup %2851  ;;  %2206 = vst.msk [vmem:[%s3755_s10] sm:$0xff] %vm2205_vm4, %v2197_v47  ;;  %v2192_v55 = vsub.f32 %v2128_v28, %v2180_v59 }
0x1a04   :  { %v2854_v20 = vpop.eup %2853  ;;  %v2119_v0 = vsub.f32 %v3609_v39, %v2111_v26  ;;  %v2100_v4 = vmul.f32 0.6931472, %v2852_v19  ;;  %v2193_v48 = vsub.f32 %v2129_v14, %v2182_v25 }
0x1a05   :  { %v2856_v9 = vpop.eup %2855  ;;  %v2102_v23 = vmul.f32 0.6931472, %v2854_v20 }
0x1a06   :  { %v2199_v34 = vsel %vm2020_vm3, %v2119_v0, %v2191_v3  ;;  %v2112_v29 = vadd.f32 %v2100_v4, %v3645_v30  ;;  %v2184_v40 = vmul.f32 0.6931472, %v2856_v9  ;;  %v2130_v30 = vmin.f32 %v3617_v45, 0.0 }
0x1a07   :  { %v2858_v36 = vpop.eup %2857  ;;  %2208 = vst.msk [vmem:[%s3755_s10 + $0x10] sm:$0xff] %vm2205_vm4, %v2199_v34  ;;  %v2113_v39 = vadd.f32 %v2102_v23, %v3647_v38 }
0x1a08   :  { %v2120_v42 = vsub.f32 %v3611_v15, %v2112_v29  ;;  %v2104_v46 = vmul.f32 0.6931472, %v2858_v36  ;;  %v2194_v56 = vsub.f32 %v2130_v30, %v2184_v40 }
0x1a09   :  { %v2121_v50 = vsub.f32 %v3615_v17, %v2113_v39 }
0x1a0a   :  { %v2200_v51 = vsel %vm2020_vm3, %v2120_v42, %v2192_v55  ;;  %v2114_v52 = vadd.f32 %v2104_v46, %v3653_v31  ;;  %v2140_v31 = vand.u32 2147483647, %v3625_v22 }
0x1a0b   :  { %2209 = vst.msk [vmem:[%s3755_s10 + $0x18] sm:$0xff] %vm2205_vm4, %v2200_v51  ;;  %v2201_v38 = vsel %vm2020_vm3, %v2121_v50, %v2193_v48 }
0x1a0c   :  { %2210 = vst.msk [vmem:[%s3755_s10 + $0x20] sm:$0xff] %vm2205_vm4, %v2201_v38  ;;  %v2122_v15 = vsub.f32 %v3617_v45, %v2114_v52  ;;  %v2148_v44 = vsub.f32 0.0, %v2140_v31 }
0x1a0e   :  { %v2202_v17 = vsel %vm2020_vm3, %v2122_v15, %v2194_v56  ;;  %v2163_v27 = vmul.f32 1.442695, %v2148_v44 }
0x1a0f   :  { %2211 = vst.msk [vmem:[%s3755_s10 + $0x28] sm:$0xff] %vm2205_vm4, %v2202_v17 }
0x1a10   :  { %2859 = vpow2.f32 %v2163_v27 }
0x1a11   :  { %2861 = vpow2.f32 %v2161_v8 }
0x1a1d   :  { %v2860_v62 = vpop.eup %2859 }
0x1a1e   :  { %v2862_v63 = vpop.eup %2861  ;;  %v2172_v45 = vadd.f32 1.0, %v2860_v62 }
0x1a1f   :  { %v2171_v1 = vadd.f32 1.0, %v2862_v63 }
0x1a20   :  { %2863 = vlog2.f32 %v2172_v45 }
0x1a21   :  { %2865 = vlog2.f32 %v2171_v1 }
0x1a2d   :  { %v2864_v10 = vpop.eup %2863 }
0x1a2e   :  { %v2866_v11 = vpop.eup %2865  ;;  %v2188_v21 = vmul.f32 0.6931472, %v2864_v10 }
0x1a2f   :  { %v2186_v35 = vmul.f32 0.6931472, %v2866_v11 }
0x1a30   :  { %v2196_v13 = vsub.f32 %v2132_v54, %v2188_v21 }
0x1a31   :  { %v2195_v16 = vsub.f32 %v2131_v57, %v2186_v35 }
0x1a5c   :  { %v2092_v2 = vpop.xlane.xlu0 %2091 }
0x1a5d   :  { %2867 = vlog2.f32 %v2092_v2 }
0x1a5e   :  { %v2089_v6 = vpop.xlane.xlu1 %2088 }
0x1a5f   :  { %2869 = vlog2.f32 %v2089_v6 }
0x1a6a   :  { %v2868_v33 = vpop.eup %2867 }
0x1a6b   :  { %v2108_v49 = vmul.f32 0.6931472, %v2868_v33 }
0x1a6c   :  { %v2870_v12 = vpop.eup %2869 }
0x1a6d   :  { %v2116_v37 = vadd.f32 %v2108_v49, %v3663_v53  ;;  %v2106_v41 = vmul.f32 0.6931472, %v2870_v12 }
0x1a6f   :  { %v2124_v43 = vsub.f32 %v3625_v22, %v2116_v37  ;;  %v2115_v7 = vadd.f32 %v2106_v41, %v3667_v5 }
0x1a71   :  { %v2204_v60 = vsel %vm2020_vm3, %v2124_v43, %v2196_v13  ;;  %v2123_v18 = vsub.f32 %v3627_v24, %v2115_v7 }
0x1a72   :  { %2213 = vst.msk [vmem:[%s3755_s10 + $0x38] sm:$0xff] %vm2205_vm4, %v2204_v60 }
0x1a73   :  { %v2203_v53 = vsel %vm2020_vm3, %v2123_v18, %v2195_v16 }
0x1a74   :  { %2212 = vst.msk [vmem:[%s3755_s10 + $0x30] sm:$0xff] %vm2205_vm4, %v2203_v53 }
0x1a75   :  { %2218 = vsyncpa [#allocation3], 1 }
0x1a76   :  { %2219 = vsyncpa [#allocation5], 1 }

</bundles_post_ra>
